<compile_context>
chip_gen: v5e
topology: v5e:2x2
jax: 0.10.0
libtpu: 0.0.40
codegen_flags: <defaults>
</compile_context>

<pallas_src>
import jax
import jax.numpy as jnp
from jax.experimental import pallas as pl
from jax.experimental.pallas import tpu as pltpu


def _round_up(x, m):
    return ((x + m - 1) // m) * m


# ----------------------------------------------------------------------------
# Pallas kernel: one MXU dot per M-tile, bias + LeakyReLU fused in the epilogue
# ----------------------------------------------------------------------------
def _gemm_bias_lrelu_kernel(x_ref, w_ref, b_ref, o_ref):
    # x_ref: (tm, Kp) f32    im2col patch rows (cast to bf16 on the VPU here)
    # w_ref: (Kp, Cout) bf16 pre-packed transposed conv weight (VMEM resident)
    # b_ref: (1, Cout) f32   bias
    # o_ref: (tm, Cout) f32  output tile (lane-dense: Cout is a 128 multiple)
    acc = jnp.dot(x_ref[...].astype(jnp.bfloat16), w_ref[...],
                  preferred_element_type=jnp.float32)
    acc = acc + b_ref[...]
    o_ref[...] = jnp.maximum(acc, 0.2 * acc).astype(o_ref.dtype)  # LeakyReLU(0.2)


def gemm_bias_lrelu(patches, w_packed, b_packed):
    """LeakyReLU_{0.2}(patches @ w_packed + b_packed) -> (M, Cout) f32.

    patches : (M, K) f32 (unpadded)
    w_packed: (Kp, Cout) bf16, K zero-padded to Kp (a 128 multiple) at pack time
    b_packed: (1, Cout) f32
    """
    M, K = patches.shape
    Kp, Cout = w_packed.shape
    assert Kp >= K and Kp % 128 == 0 and Cout % 128 == 0

    # bf16 sublane packing: round M tiles to 16 (98 -> 112, 18 -> 32, 2 -> 16).
    tm = min(256, _round_up(M, 16))
    Mp = _round_up(M, tm)

    # Zero padding contributes exact zeros to the dot.
    xp = jnp.pad(patches, ((0, Mp - M), (0, Kp - K)))

    out = pl.pallas_call(
        _gemm_bias_lrelu_kernel,
        out_shape=jax.ShapeDtypeStruct((Mp, Cout), jnp.float32),
        grid_spec=pltpu.PrefetchScalarGridSpec(
            num_scalar_prefetch=0,
            grid=(Mp // tm,),                 # single step at these sizes; K untiled
            in_specs=[
                pl.BlockSpec((tm, Kp), lambda i: (i, 0)),
                pl.BlockSpec((Kp, Cout), lambda i: (0, 0)),
                pl.BlockSpec((1, Cout), lambda i: (0, 0)),
            ],
            out_specs=pl.BlockSpec((tm, Cout), lambda i: (i, 0)),
        ),
        compiler_params=pltpu.CompilerParams(
            dimension_semantics=("parallel",),
        ),
    )(xp, w_packed, b_packed)
    return out[:M]


# ----------------------------------------------------------------------------
# Plain-JAX glue: NHWC im2col over a pre-padded window (tiny arrays only)
# ----------------------------------------------------------------------------
def _im2col(xw, k, stride, ho, wo):
    """xw: (N, Hp, Wp, C) pre-padded window -> (N*ho*wo, k*k*C); K order (kh,kw,c)."""
    n = xw.shape[0]
    c = xw.shape[3]
    cols = []
    for ki in range(k):
        for kj in range(k):
            cols.append(xw[:, ki:ki + stride * (ho - 1) + 1:stride,
                            kj:kj + stride * (wo - 1) + 1:stride, :])
    patches = jnp.stack(cols, axis=3)                    # (N, ho, wo, k*k, C)
    return patches.reshape(n * ho * wo, k * k * c)


# ----------------------------------------------------------------------------
# One-time parameter packing (outside the jitted forward)
# ----------------------------------------------------------------------------
def _pack_weight(w, b, cout_pad=None):
    """(Cout,Cin,kh,kw) PyTorch conv weight -> ((Kp,Cp) bf16, (1,Cp) f32)."""
    cout, cin, kh, kw = w.shape
    k_flat = kh * kw * cin
    kp = _round_up(k_flat, 128)
    cp = cout_pad if cout_pad is not None else cout
    wt = jnp.transpose(w, (2, 3, 1, 0)).reshape(k_flat, cout)   # (kh,kw,cin) x cout
    wt = jnp.pad(wt, ((0, kp - k_flat), (0, cp - cout))).astype(jnp.bfloat16)
    bp = jnp.pad(b, (0, cp - cout)).astype(jnp.float32).reshape(1, cp)
    return wt, bp


def pack_params(params):
    """One-time weight relayout / cast / pad, done OUTSIDE the jitted forward."""
    (w1, b1), (w2, b2), (w3, b3) = params
    # Layer 1: Cout 64 -> 128 zero columns (lane-dense output store).
    p1 = _pack_weight(w1, b1, cout_pad=128)
    # Layer 2: K = 25*64 = 1600 -> 1664.
    p2 = _pack_weight(w2, b2)
    # Layer 3: the single [0,0] output only reads kernel positions (2..4, 2..4);
    # prune them at pack time (K: 3200 -> 1152), so its im2col is a pure reshape.
    p3 = _pack_weight(w3[:, :, 2:5, 2:5], b3)
    return (p1, p2, p3)


# ----------------------------------------------------------------------------
# Forward: NHWC end-to-end, receptive-field-pruned, three single-step GEMMs
# ----------------------------------------------------------------------------
def classifier_gan_old_forward(x_nchw, packed):
    """x: (N, 3, H, W) NCHW -> (N, 256)  (== conv_stack(x)[:, :, 0, 0])."""
    (w1, b1), (w2, b2), (w3, b3) = packed
    N, C, H, W = x_nchw.shape

    # Static receptive-field checks (exact for k=5, s=2, p=2): the final [0,0]
    # output reads layer-2 outputs 0..2, which read layer-1 outputs 0..6,
    # which read padded input rows/cols 0..16.
    k_, s_, p_ = 5, 2, 2
    assert C == 3
    assert s_ * (3 - 1) + (k_ - 1) - p_ == 6        # max layer-1 index read by layer 2
    assert s_ * (1 - 1) + (k_ - 1) - p_ == 2        # max layer-2 index read by layer 3
    full = lambda n: (n + 2 * p_ - k_) // s_ + 1
    assert full(H) >= 7 and full(W) >= 7 and full(full(H)) >= 3 and full(full(W)) >= 3, \
        "input spatially too small for the pruned [0,0] computation"

    x = jnp.transpose(x_nchw, (0, 2, 3, 1))          # single NCHW->NHWC relayout

    # Layer 1: only outputs (0..6, 0..6) are needed.
    xw = jnp.pad(x, ((0, 0), (2, 2), (2, 2), (0, 0)))[:, :17, :17, :]
    p1 = _im2col(xw, k_, s_, 7, 7)                   # (N*49, 75)
    a1 = gemm_bias_lrelu(p1, w1, b1)[:, :64]         # lane-dense store; slice 64 real ch
    a1 = a1.reshape(N, 7, 7, 64)

    # Layer 2: only outputs (0..2, 0..2) are needed (zero pad on top/left only).
    a1p = jnp.pad(a1, ((0, 0), (2, 0), (2, 0), (0, 0)))   # (N, 9, 9, 64)
    p2 = _im2col(a1p, k_, s_, 3, 3)                  # (N*9, 1600)
    a2 = gemm_bias_lrelu(p2, w2, b2)                 # (N*9, 128)

    # Layer 3: single output; its im2col is a reshape of layer-2's (3,3,128)
    # output (the weight was pruned to the matching kernel positions).
    p3 = a2.reshape(N, 9 * 128)                      # (N, 1152)
    out = gemm_bias_lrelu(p3, w3, b3)                # (N, 256)
    return out


# ----------------------------------------------------------------------------
# Deterministic parameter init (PyTorch layout) + pure-XLA f32 reference
# ----------------------------------------------------------------------------
def init_params(key):
    shapes = [
        ((64, 3, 5, 5), (64,)),
        ((128, 64, 5, 5), (128,)),
        ((256, 128, 5, 5), (256,)),
    ]
    params = []
    for (wshape, bshape) in shapes:
        key, kw, kb = jax.random.split(key, 3)
        fan_in = wshape[1] * wshape[2] * wshape[3]
        bound = 1.0 / jnp.sqrt(fan_in)
        w = jax.random.uniform(kw, wshape, jnp.float32, -bound, bound)
        b = jax.random.uniform(kb, bshape, jnp.float32, -bound, bound)
        params.append((w, b))
    return params


def reference_forward(x_nchw, params):
    h = x_nchw
    for (w, b) in params:
        h = jnp.pad(h, ((0, 0), (0, 0), (2, 2), (2, 2)))
        h = jax.lax.conv_general_dilated(
            h, w, window_strides=(2, 2), padding="VALID",
            dimension_numbers=("NCHW", "OIHW", "NCHW"))
        h = h + b.reshape(1, -1, 1, 1)
        h = jnp.where(h > 0, h, 0.2 * h)
    return h[:, :, 0, 0]


if __name__ == "__main__":
    key = jax.random.PRNGKey(0)
    kx, kp = jax.random.split(key)

    # Small SVHN-like input: batch=2, 3 channels, 16x16 spatial.
    x = jax.random.normal(kx, (2, 3, 16, 16), dtype=jnp.float32)
    params = init_params(kp)
    packed = pack_params(params)      # one-time pack, not part of the jitted forward

    fwd = jax.jit(classifier_gan_old_forward)
    out = jax.block_until_ready(fwd(x, packed))

    assert out.shape == (2, 256), out.shape
    assert out.dtype == jnp.float32
    assert bool(jnp.all(jnp.isfinite(out)))

    # bf16 MXU operands vs f32 reference -> ~1e-2-level relative differences.
    ref = jax.block_until_ready(reference_forward(x, params))
    assert jnp.allclose(out, ref, rtol=5e-2, atol=5e-2), float(
        jnp.max(jnp.abs(out - ref)))

    print("KERNEL_OK")
</pallas_src>

<mosaic_0001>
module attributes {stable_mosaic.version = 11 : i64} {
  func.func @_gemm_bias_lrelu_kernel(%arg0: i32, %arg1: memref<112x128xf32, #tpu.memory_space<vmem>>, %arg2: memref<128x128xbf16, #tpu.memory_space<vmem>>, %arg3: memref<1x128xf32, #tpu.memory_space<vmem>>, %arg4: memref<112x128xf32, #tpu.memory_space<vmem>>) attributes {dimension_semantics = [#tpu.dimension_semantics<parallel>], iteration_bounds = array<i64: 1>, scalar_prefetch = 0 : i64, scratch_operands = 0 : i64, tpu.core_type = #tpu.core_type<tc>, window_params = [{transform_indices = @transform_0, window_bounds = array<i64: 112, 128>}, {pipeline_mode = #tpu.pipeline_mode<synchronous>, transform_indices = @transform_1, window_bounds = array<i64: 128, 128>}, {pipeline_mode = #tpu.pipeline_mode<synchronous>, transform_indices = @transform_2, window_bounds = array<i64: 1, 128>}, {transform_indices = @transform_3, window_bounds = array<i64: 112, 128>}]} {
    %c0 = arith.constant 0 : index
    %c0_0 = arith.constant 0 : index
    %0 = vector.load %arg1[%c0, %c0_0] : memref<112x128xf32, #tpu.memory_space<vmem>>, vector<112x128xf32>
    %1 = arith.truncf %0 : vector<112x128xf32> to vector<112x128xbf16>
    %c0_1 = arith.constant 0 : index
    %c0_2 = arith.constant 0 : index
    %2 = vector.load %arg2[%c0_1, %c0_2] : memref<128x128xbf16, #tpu.memory_space<vmem>>, vector<128x128xbf16>
    %cst = arith.constant dense<0.000000e+00> : vector<112x128xf32>
    %3 = tpu.matmul %1, %2, %cst {dimension_numbers = #tpu.dot_dimension_numbers<[1], [0], [0], [1], [0, 0, 1, 1], [], []>} : vector<112x128xbf16>, vector<128x128xbf16>, vector<112x128xf32> -> vector<112x128xf32>
    %c0_3 = arith.constant 0 : index
    %c0_4 = arith.constant 0 : index
    %4 = vector.load %arg3[%c0_3, %c0_4] : memref<1x128xf32, #tpu.memory_space<vmem>>, vector<1x128xf32>
    %5 = vector.broadcast %4 : vector<1x128xf32> to vector<112x128xf32>
    %6 = arith.addf %3, %5 : vector<112x128xf32>
    %cst_5 = arith.constant 2.000000e-01 : f32
    %7 = vector.broadcast %cst_5 : f32 to vector<112x128xf32>
    %8 = arith.mulf %7, %6 : vector<112x128xf32>
    %9 = arith.maximumf %6, %8 : vector<112x128xf32>
    %c0_6 = arith.constant 0 : index
    %c0_7 = arith.constant 0 : index
    %10 = vector.load %arg4[%c0_6, %c0_7] : memref<112x128xf32, #tpu.memory_space<vmem>>, vector<112x128xf32>
    tpu.vector_store %arg4[%c0_6, %c0_7], %9 {strides = array<i32>} : memref<112x128xf32, #tpu.memory_space<vmem>>, vector<112x128xf32>,
    return
  }
  func.func @transform_0(%arg0: i32) -> (i32, i32) {
    %c0_i32 = arith.constant 0 : i32
    %c0_i32_0 = arith.constant 0 : i32
    return %arg0, %c0_i32 : i32, i32
  }
  func.func @transform_1(%arg0: i32) -> (i32, i32) {
    %c0_i32 = arith.constant 0 : i32
    %c0_i32_0 = arith.constant 0 : i32
    %c0_i32_1 = arith.constant 0 : i32
    return %c0_i32, %c0_i32_0 : i32, i32
  }
  func.func @transform_2(%arg0: i32) -> (i32, i32) {
    %c0_i32 = arith.constant 0 : i32
    %c0_i32_0 = arith.constant 0 : i32
    %c0_i32_1 = arith.constant 0 : i32
    return %c0_i32, %c0_i32_0 : i32, i32
  }
  func.func @transform_3(%arg0: i32) -> (i32, i32) {
    %c0_i32 = arith.constant 0 : i32
    %c0_i32_0 = arith.constant 0 : i32
    return %arg0, %c0_i32 : i32, i32
  }
}

module attributes {stable_mosaic.version = 11 : i64} {
  func.func @_gemm_bias_lrelu_kernel(%arg0: i32, %arg1: memref<32x1664xf32, #tpu.memory_space<vmem>>, %arg2: memref<1664x128xbf16, #tpu.memory_space<vmem>>, %arg3: memref<1x128xf32, #tpu.memory_space<vmem>>, %arg4: memref<32x128xf32, #tpu.memory_space<vmem>>) attributes {dimension_semantics = [#tpu.dimension_semantics<parallel>], iteration_bounds = array<i64: 1>, scalar_prefetch = 0 : i64, scratch_operands = 0 : i64, tpu.core_type = #tpu.core_type<tc>, window_params = [{transform_indices = @transform_0, window_bounds = array<i64: 32, 1664>}, {pipeline_mode = #tpu.pipeline_mode<synchronous>, transform_indices = @transform_1, window_bounds = array<i64: 1664, 128>}, {pipeline_mode = #tpu.pipeline_mode<synchronous>, transform_indices = @transform_2, window_bounds = array<i64: 1, 128>}, {transform_indices = @transform_3, window_bounds = array<i64: 32, 128>}]} {
    %c0 = arith.constant 0 : index
    %c0_0 = arith.constant 0 : index
    %0 = vector.load %arg1[%c0, %c0_0] : memref<32x1664xf32, #tpu.memory_space<vmem>>, vector<32x1664xf32>
    %1 = arith.truncf %0 : vector<32x1664xf32> to vector<32x1664xbf16>
    %c0_1 = arith.constant 0 : index
    %c0_2 = arith.constant 0 : index
    %2 = vector.load %arg2[%c0_1, %c0_2] : memref<1664x128xbf16, #tpu.memory_space<vmem>>, vector<1664x128xbf16>
    %cst = arith.constant dense<0.000000e+00> : vector<32x128xf32>
    %3 = tpu.matmul %1, %2, %cst {dimension_numbers = #tpu.dot_dimension_numbers<[1], [0], [0], [1], [0, 0, 1, 1], [], []>} : vector<32x1664xbf16>, vector<1664x128xbf16>, vector<32x128xf32> -> vector<32x128xf32>
    %c0_3 = arith.constant 0 : index
    %c0_4 = arith.constant 0 : index
    %4 = vector.load %arg3[%c0_3, %c0_4] : memref<1x128xf32, #tpu.memory_space<vmem>>, vector<1x128xf32>
    %5 = vector.broadcast %4 : vector<1x128xf32> to vector<32x128xf32>
    %6 = arith.addf %3, %5 : vector<32x128xf32>
    %cst_5 = arith.constant 2.000000e-01 : f32
    %7 = vector.broadcast %cst_5 : f32 to vector<32x128xf32>
    %8 = arith.mulf %7, %6 : vector<32x128xf32>
    %9 = arith.maximumf %6, %8 : vector<32x128xf32>
    %c0_6 = arith.constant 0 : index
    %c0_7 = arith.constant 0 : index
    %10 = vector.load %arg4[%c0_6, %c0_7] : memref<32x128xf32, #tpu.memory_space<vmem>>, vector<32x128xf32>
    tpu.vector_store %arg4[%c0_6, %c0_7], %9 {strides = array<i32>} : memref<32x128xf32, #tpu.memory_space<vmem>>, vector<32x128xf32>,
    return
  }
  func.func @transform_0(%arg0: i32) -> (i32, i32) {
    %c0_i32 = arith.constant 0 : i32
    %c0_i32_0 = arith.constant 0 : i32
    return %arg0, %c0_i32 : i32, i32
  }
  func.func @transform_1(%arg0: i32) -> (i32, i32) {
    %c0_i32 = arith.constant 0 : i32
    %c0_i32_0 = arith.constant 0 : i32
    %c0_i32_1 = arith.constant 0 : i32
    return %c0_i32, %c0_i32_0 : i32, i32
  }
  func.func @transform_2(%arg0: i32) -> (i32, i32) {
    %c0_i32 = arith.constant 0 : i32
    %c0_i32_0 = arith.constant 0 : i32
    %c0_i32_1 = arith.constant 0 : i32
    return %c0_i32, %c0_i32_0 : i32, i32
  }
  func.func @transform_3(%arg0: i32) -> (i32, i32) {
    %c0_i32 = arith.constant 0 : i32
    %c0_i32_0 = arith.constant 0 : i32
    return %arg0, %c0_i32 : i32, i32
  }
}

module attributes {stable_mosaic.version = 11 : i64} {
  func.func @_gemm_bias_lrelu_kernel(%arg0: i32, %arg1: memref<16x1152xf32, #tpu.memory_space<vmem>>, %arg2: memref<1152x256xbf16, #tpu.memory_space<vmem>>, %arg3: memref<1x256xf32, #tpu.memory_space<vmem>>, %arg4: memref<16x256xf32, #tpu.memory_space<vmem>>) attributes {dimension_semantics = [#tpu.dimension_semantics<parallel>], iteration_bounds = array<i64: 1>, scalar_prefetch = 0 : i64, scratch_operands = 0 : i64, tpu.core_type = #tpu.core_type<tc>, window_params = [{transform_indices = @transform_0, window_bounds = array<i64: 16, 1152>}, {pipeline_mode = #tpu.pipeline_mode<synchronous>, transform_indices = @transform_1, window_bounds = array<i64: 1152, 256>}, {pipeline_mode = #tpu.pipeline_mode<synchronous>, transform_indices = @transform_2, window_bounds = array<i64: 1, 256>}, {transform_indices = @transform_3, window_bounds = array<i64: 16, 256>}]} {
    %c0 = arith.constant 0 : index
    %c0_0 = arith.constant 0 : index
    %0 = vector.load %arg1[%c0, %c0_0] : memref<16x1152xf32, #tpu.memory_space<vmem>>, vector<16x1152xf32>
    %1 = arith.truncf %0 : vector<16x1152xf32> to vector<16x1152xbf16>
    %c0_1 = arith.constant 0 : index
    %c0_2 = arith.constant 0 : index
    %2 = vector.load %arg2[%c0_1, %c0_2] : memref<1152x256xbf16, #tpu.memory_space<vmem>>, vector<1152x256xbf16>
    %cst = arith.constant dense<0.000000e+00> : vector<16x256xf32>
    %3 = tpu.matmul %1, %2, %cst {dimension_numbers = #tpu.dot_dimension_numbers<[1], [0], [0], [1], [0, 0, 1, 1], [], []>} : vector<16x1152xbf16>, vector<1152x256xbf16>, vector<16x256xf32> -> vector<16x256xf32>
    %c0_3 = arith.constant 0 : index
    %c0_4 = arith.constant 0 : index
    %4 = vector.load %arg3[%c0_3, %c0_4] : memref<1x256xf32, #tpu.memory_space<vmem>>, vector<1x256xf32>
    %5 = vector.broadcast %4 : vector<1x256xf32> to vector<16x256xf32>
    %6 = arith.addf %3, %5 : vector<16x256xf32>
    %cst_5 = arith.constant 2.000000e-01 : f32
    %7 = vector.broadcast %cst_5 : f32 to vector<16x256xf32>
    %8 = arith.mulf %7, %6 : vector<16x256xf32>
    %9 = arith.maximumf %6, %8 : vector<16x256xf32>
    %c0_6 = arith.constant 0 : index
    %c0_7 = arith.constant 0 : index
    %10 = vector.load %arg4[%c0_6, %c0_7] : memref<16x256xf32, #tpu.memory_space<vmem>>, vector<16x256xf32>
    tpu.vector_store %arg4[%c0_6, %c0_7], %9 {strides = array<i32>} : memref<16x256xf32, #tpu.memory_space<vmem>>, vector<16x256xf32>,
    return
  }
  func.func @transform_0(%arg0: i32) -> (i32, i32) {
    %c0_i32 = arith.constant 0 : i32
    %c0_i32_0 = arith.constant 0 : i32
    return %arg0, %c0_i32 : i32, i32
  }
  func.func @transform_1(%arg0: i32) -> (i32, i32) {
    %c0_i32 = arith.constant 0 : i32
    %c0_i32_0 = arith.constant 0 : i32
    %c0_i32_1 = arith.constant 0 : i32
    return %c0_i32, %c0_i32_0 : i32, i32
  }
  func.func @transform_2(%arg0: i32) -> (i32, i32) {
    %c0_i32 = arith.constant 0 : i32
    %c0_i32_0 = arith.constant 0 : i32
    %c0_i32_1 = arith.constant 0 : i32
    return %c0_i32, %c0_i32_0 : i32, i32
  }
  func.func @transform_3(%arg0: i32) -> (i32, i32) {
    %c0_i32 = arith.constant 0 : i32
    %c0_i32_0 = arith.constant 0 : i32
    return %arg0, %c0_i32 : i32, i32
  }
}

</mosaic_0001>

<bundles_post_ra>
// kernel: classifier_gan_old_forward.3
= control target key start
LH: loop header
LB: loop body
LE: loop exit
PB: predicated region body
PF: predicated region fallthrough
CT: control target
= control target key end

     0   :  { %s405_s1 = inlined_call_operand.vmem [shape: bf16[128,128], index: 1, kind: input, shape index: {}]   ;;  %s406_s2 = inlined_call_operand.vmem [shape: f32[1,128], index: 2, kind: input, shape index: {}]   ;;  %s407_s0 = inlined_call_operand.vmem [shape: f32[112,128], index: 0, kind: input, shape index: {}]   ;;  %s408_s3 = inlined_call_operand.vmem [shape: f32[112,128], index: 3, kind: output, shape index: {}]  }
   0x1   :  { %v232_v0 = vld [vmem:[%s405_s1 + $0x38] sm:$0xff]  ;;  %v231_v1 = vld [vmem:[%s405_s1 + $0x30] sm:$0xff]  ;;  %v230_v2 = vld [vmem:[%s405_s1 + $0x28] sm:$0xff] }
   0x2   :  { %233 = vmatpush.bf16.msra.mxu1 %v232_v0  ;;  %234 = vmatpush.bf16.msra.mxu2 %v232_v0  ;;  %v229_v3 = vld [vmem:[%s405_s1 + $0x20] sm:$0xff]  ;;  %v228_v4 = vld [vmem:[%s405_s1 + $0x18] sm:$0xff]  ;;  %v227_v5 = vld [vmem:[%s405_s1 + $0x10] sm:$0xff] }
   0x3   :  { %235 = vmatpush.bf16.msra.mxu3 %v232_v0  ;;  %103 = vmatpush.bf16.msra.mxu0 %v232_v0  ;;  %v226_v6 = vld [vmem:[%s405_s1 + $0x8] sm:$0xff]  ;;  %v225_v7 = vld [vmem:[%s405_s1] sm:$0xff]  ;;  %v16_v8 = vld [vmem:[%s407_s0 + $0x10] sm:$0xff] }
   0x4   :  { %v17_v9 = vld [vmem:[%s407_s0 + $0x18] sm:$0xff]  ;;  %v20_v10 = vld [vmem:[%s407_s0 + $0x30] sm:$0xff]  ;;  %v14_v14 = vld [vmem:[%s407_s0] sm:$0xff] }
   0x5   :  { %v21_v11 = vld [vmem:[%s407_s0 + $0x38] sm:$0xff]  ;;  %v24_v12 = vld [vmem:[%s407_s0 + $0x50] sm:$0xff]  ;;  %v15_v15 = vld [vmem:[%s407_s0 + $0x8] sm:$0xff]  ;;  %v29_v16 = vpack.c.bf16 %v17_v9, %v16_v8 }
   0x6   :  { %236 = vmatpush.bf16.msra.mxu1 %v231_v1  ;;  %237 = vmatpush.bf16.msra.mxu2 %v231_v1  ;;  %v25_v13 = vld [vmem:[%s407_s0 + $0x58] sm:$0xff]  ;;  %v31_v17 = vpack.c.bf16 %v21_v11, %v20_v10  ;;  %v28_v19 = vpack.c.bf16 %v15_v15, %v14_v14  ;;  %v18_v20 = vld [vmem:[%s407_s0 + $0x20] sm:$0xff]  ;;  %v19_v21 = vld [vmem:[%s407_s0 + $0x28] sm:$0xff] }
   0x7   :  { %238 = vmatpush.bf16.msra.mxu3 %v231_v1  ;;  %104 = vmatpush.bf16.msra.mxu0 %v231_v1  ;;  %v33_v18 = vpack.c.bf16 %v25_v13, %v24_v12  ;;  %v22_v22 = vld [vmem:[%s407_s0 + $0x40] sm:$0xff]  ;;  %v23_v23 = vld [vmem:[%s407_s0 + $0x48] sm:$0xff]  ;;  %v30_v26 = vpack.c.bf16 %v19_v21, %v18_v20 }
   0x8   :  { %v26_v24 = vld [vmem:[%s407_s0 + $0x60] sm:$0xff]  ;;  %v27_v25 = vld [vmem:[%s407_s0 + $0x68] sm:$0xff]  ;;  %v32_v27 = vpack.c.bf16 %v23_v23, %v22_v22 }
   0x9   :  { %v34_v28 = vpack.c.bf16 %v27_v25, %v26_v24  ;;  %v347_v29 = vld [vmem:[%s406_s2] ss:$0 sm:$0xff] }
   0xa   :  { %239 = vmatpush.bf16.msra.mxu1 %v230_v2  ;;  %240 = vmatpush.bf16.msra.mxu2 %v230_v2 }
   0xb   :  { %241 = vmatpush.bf16.msra.mxu3 %v230_v2  ;;  %105 = vmatpush.bf16.msra.mxu0 %v230_v2 }
   0xe   :  { %242 = vmatpush.bf16.msra.mxu1 %v229_v3  ;;  %243 = vmatpush.bf16.msra.mxu2 %v229_v3 }
   0xf   :  { %244 = vmatpush.bf16.msra.mxu3 %v229_v3  ;;  %106 = vmatpush.bf16.msra.mxu0 %v229_v3 }
  0x12   :  { %245 = vmatpush.bf16.msra.mxu1 %v228_v4  ;;  %246 = vmatpush.bf16.msra.mxu2 %v228_v4 }
  0x13   :  { %247 = vmatpush.bf16.msra.mxu3 %v228_v4  ;;  %107 = vmatpush.bf16.msra.mxu0 %v228_v4 }
  0x16   :  { %248 = vmatpush.bf16.msra.mxu1 %v227_v5  ;;  %249 = vmatpush.bf16.msra.mxu2 %v227_v5 }
  0x17   :  { %250 = vmatpush.bf16.msra.mxu3 %v227_v5  ;;  %108 = vmatpush.bf16.msra.mxu0 %v227_v5 }
  0x1a   :  { %251 = vmatpush.bf16.msra.mxu1 %v226_v6  ;;  %252 = vmatpush.bf16.msra.mxu2 %v226_v6 }
  0x1b   :  { %253 = vmatpush.bf16.msra.mxu3 %v226_v6  ;;  %109 = vmatpush.bf16.msra.mxu0 %v226_v6 }
  0x1e   :  { %254 = vmatpush.bf16.msra.mxu1 %v225_v7  ;;  %255 = vmatpush.bf16.msra.mxu2 %v225_v7 }
  0x1f   :  { %256 = vmatpush.bf16.msra.mxu3 %v225_v7  ;;  %110 = vmatpush.bf16.msra.mxu0 %v225_v7 }
  0x21   :  { %116 = vmatmul.bf16.vlgmr.msra.gmra.mxu1 %v29_v16  ;;  %126 = vmatmul.bf16.vlgmr.msra.gmra.mxu2 %v31_v17 }
  0x22   :  { %136 = vmatmul.bf16.vlgmr.msra.gmra.mxu3 %v33_v18  ;;  %111 = vmatmul.bf16.vlgmr.msra.gmra.mxu0 %v28_v19 }
  0x31   :  { %121 = vmatmul.bf16.gmra.mxu1 %v30_v26  ;;  %131 = vmatmul.bf16.gmra.mxu2 %v32_v27 }
  0x32   :  { %141 = vmatmul.bf16.gmra.mxu3 %v34_v28 }
  0x9e   :  { %v117_v30 = vpop.f32.mrf.mxu1 }
  0x9f   :  { %v118_v31 = vadd.f32 %v347_v29, %v117_v30  ;;  %v112_v32 = vpop.f32.mrf.mxu0 }
  0xa0   :  { %v113_v33 = vadd.f32 %v347_v29, %v112_v32 }
  0xa1   :  { %v149_v34 = vmul.f32 0.2, %v118_v31 }
  0xa2   :  { %v147_v35 = vmul.f32 0.2, %v113_v33 }
  0xa3   :  { %v163_v36 = vmax.f32 %v118_v31, %v149_v34 }
  0xa4   :  { %v127_v37 = vpop.f32.mrf.mxu2  ;;  %v161_v38 = vmax.f32 %v113_v33, %v147_v35 }
  0xa5   :  { %177 = vst [vmem:[%s408_s3 + $0x10] sm:$0xff] %v163_v36  ;;  %v128_v39 = vadd.f32 %v347_v29, %v127_v37  ;;  %v137_v40 = vpop.f32.mrf.mxu3 }
  0xa6   :  { %v138_v41 = vadd.f32 %v347_v29, %v137_v40  ;;  %v119_v42 = vpop.f32.mrf.mxu1  ;;  %175 = vst [vmem:[%s408_s3] sm:$0xff] %v161_v38 }
  0xa7   :  { %v153_v43 = vmul.f32 0.2, %v128_v39  ;;  %v120_v44 = vadd.f32 %v347_v29, %v119_v42  ;;  %v114_v45 = vpop.f32.mrf.mxu0 }
  0xa8   :  { %v157_v46 = vmul.f32 0.2, %v138_v41  ;;  %v115_v47 = vadd.f32 %v347_v29, %v114_v45 }
  0xa9   :  { %v167_v48 = vmax.f32 %v128_v39, %v153_v43  ;;  %v150_v49 = vmul.f32 0.2, %v120_v44 }
  0xaa   :  { %v171_v50 = vmax.f32 %v138_v41, %v157_v46  ;;  %v148_v51 = vmul.f32 0.2, %v115_v47 }
  0xab   :  { %181 = vst [vmem:[%s408_s3 + $0x30] sm:$0xff] %v167_v48  ;;  %v164_v52 = vmax.f32 %v120_v44, %v150_v49 }
  0xac   :  { %185 = vst [vmem:[%s408_s3 + $0x50] sm:$0xff] %v171_v50  ;;  %v129_v53 = vpop.f32.mrf.mxu2  ;;  %v162_v54 = vmax.f32 %v115_v47, %v148_v51 }
  0xad   :  { %178 = vst [vmem:[%s408_s3 + $0x18] sm:$0xff] %v164_v52  ;;  %v130_v55 = vadd.f32 %v347_v29, %v129_v53  ;;  %v139_v56 = vpop.f32.mrf.mxu3 }
  0xae   :  { %v140_v57 = vadd.f32 %v347_v29, %v139_v56  ;;  %v122_v58 = vpop.f32.mrf.mxu1  ;;  %176 = vst [vmem:[%s408_s3 + $0x8] sm:$0xff] %v162_v54 }
  0xaf   :  { %v154_v59 = vmul.f32 0.2, %v130_v55  ;;  %v123_v60 = vadd.f32 %v347_v29, %v122_v58 }
  0xb0   :  { %v158_v61 = vmul.f32 0.2, %v140_v57 }
  0xb1   :  { %v168_v62 = vmax.f32 %v130_v55, %v154_v59  ;;  %v151_v63 = vmul.f32 0.2, %v123_v60 }
  0xb2   :  { %v172_v0 = vmax.f32 %v140_v57, %v158_v61 }
  0xb3   :  { %182 = vst [vmem:[%s408_s3 + $0x38] sm:$0xff] %v168_v62  ;;  %v165_v1 = vmax.f32 %v123_v60, %v151_v63 }
  0xb4   :  { %186 = vst [vmem:[%s408_s3 + $0x58] sm:$0xff] %v172_v0  ;;  %v132_v2 = vpop.f32.mrf.mxu2 }
  0xb5   :  { %179 = vst [vmem:[%s408_s3 + $0x20] sm:$0xff] %v165_v1  ;;  %v133_v3 = vadd.f32 %v347_v29, %v132_v2  ;;  %v142_v4 = vpop.f32.mrf.mxu3 }
  0xb6   :  { %v143_v5 = vadd.f32 %v347_v29, %v142_v4  ;;  %v124_v6 = vpop.f32.mrf.mxu1 }
  0xb7   :  { %v155_v7 = vmul.f32 0.2, %v133_v3  ;;  %v125_v8 = vadd.f32 %v347_v29, %v124_v6 }
  0xb8   :  { %v159_v9 = vmul.f32 0.2, %v143_v5 }
  0xb9   :  { %v169_v10 = vmax.f32 %v133_v3, %v155_v7  ;;  %v152_v11 = vmul.f32 0.2, %v125_v8 }
  0xba   :  { %v173_v12 = vmax.f32 %v143_v5, %v159_v9 }
  0xbb   :  { %183 = vst [vmem:[%s408_s3 + $0x40] sm:$0xff] %v169_v10  ;;  %v166_v13 = vmax.f32 %v125_v8, %v152_v11 }
  0xbc   :  { %187 = vst [vmem:[%s408_s3 + $0x60] sm:$0xff] %v173_v12  ;;  %v134_v14 = vpop.f32.mrf.mxu2 }
  0xbd   :  { %180 = vst [vmem:[%s408_s3 + $0x28] sm:$0xff] %v166_v13  ;;  %v135_v15 = vadd.f32 %v347_v29, %v134_v14  ;;  %v144_v16 = vpop.f32.mrf.mxu3 }
  0xbe   :  { %v145_v17 = vadd.f32 %v347_v29, %v144_v16 }
  0xbf   :  { %v156_v18 = vmul.f32 0.2, %v135_v15 }
  0xc0   :  { %v160_v19 = vmul.f32 0.2, %v145_v17 }
  0xc1   :  { %v170_v20 = vmax.f32 %v135_v15, %v156_v18 }
  0xc2   :  { %v174_v21 = vmax.f32 %v145_v17, %v160_v19 }
  0xc3   :  { %184 = vst [vmem:[%s408_s3 + $0x48] sm:$0xff] %v170_v20 }
  0xc4   :  { %188 = vst [vmem:[%s408_s3 + $0x68] sm:$0xff] %v174_v21 }

// kernel: classifier_gan_old_forward.4
= control target key start
LH: loop header
LB: loop body
LE: loop exit
PB: predicated region body
PF: predicated region fallthrough
CT: control target
= control target key end

     0   :  { %s2223_s1 = inlined_call_operand.vmem [shape: bf16[1664,128], index: 1, kind: input, shape index: {}]   ;;  %s2224_s0 = inlined_call_operand.vmem [shape: f32[32,1664], index: 0, kind: input, shape index: {}]   ;;  %s2225_s2 = inlined_call_operand.vmem [shape: f32[1,128], index: 2, kind: input, shape index: {}]   ;;  %s2226_s3 = inlined_call_operand.vmem [shape: f32[32,128], index: 3, kind: output, shape index: {}]  }
   0x1   :  { %v1614_v0 = vld [vmem:[%s2223_s1 + $0x38] sm:$0xff]  ;;  %v1613_v4 = vld [vmem:[%s2223_s1 + $0x30] sm:$0xff]  ;;  %v1612_v8 = vld [vmem:[%s2223_s1 + $0x28] sm:$0xff] }
   0x2   :  { %v1622_v1 = vld [vmem:[%s2223_s1 + $0x78] sm:$0xff]  ;;  %928 = vmatpush.bf16.msra.mxu0 %v1614_v0  ;;  %v1621_v5 = vld [vmem:[%s2223_s1 + $0x70] sm:$0xff]  ;;  %v1620_v9 = vld [vmem:[%s2223_s1 + $0x68] sm:$0xff] }
   0x3   :  { %v1630_v2 = vld [vmem:[%s2223_s1 + $0xb8] sm:$0xff]  ;;  %947 = vmatpush.bf16.msra.mxu1 %v1622_v1  ;;  %v1629_v6 = vld [vmem:[%s2223_s1 + $0xb0] sm:$0xff]  ;;  %v1628_v10 = vld [vmem:[%s2223_s1 + $0xa8] sm:$0xff] }
   0x4   :  { %v1638_v3 = vld [vmem:[%s2223_s1 + $0xf8] sm:$0xff]  ;;  %966 = vmatpush.bf16.msra.mxu2 %v1630_v2  ;;  %v1637_v7 = vld [vmem:[%s2223_s1 + $0xf0] sm:$0xff]  ;;  %v1636_v11 = vld [vmem:[%s2223_s1 + $0xe8] sm:$0xff] }
   0x5   :  { %985 = vmatpush.bf16.msra.mxu3 %v1638_v3  ;;  %v1611_v12 = vld [vmem:[%s2223_s1 + $0x20] sm:$0xff]  ;;  %v1610_v16 = vld [vmem:[%s2223_s1 + $0x18] sm:$0xff]  ;;  %v1609_v20 = vld [vmem:[%s2223_s1 + $0x10] sm:$0xff] }
   0x6   :  { %929 = vmatpush.bf16.msra.mxu0 %v1613_v4  ;;  %v1619_v13 = vld [vmem:[%s2223_s1 + $0x60] sm:$0xff]  ;;  %v1618_v17 = vld [vmem:[%s2223_s1 + $0x58] sm:$0xff]  ;;  %v1617_v21 = vld [vmem:[%s2223_s1 + $0x50] sm:$0xff] }
   0x7   :  { %948 = vmatpush.bf16.msra.mxu1 %v1621_v5  ;;  %v1627_v14 = vld [vmem:[%s2223_s1 + $0xa0] sm:$0xff]  ;;  %v1626_v18 = vld [vmem:[%s2223_s1 + $0x98] sm:$0xff]  ;;  %v1625_v22 = vld [vmem:[%s2223_s1 + $0x90] sm:$0xff] }
   0x8   :  { %967 = vmatpush.bf16.msra.mxu2 %v1629_v6  ;;  %v1635_v15 = vld [vmem:[%s2223_s1 + $0xe0] sm:$0xff]  ;;  %v1634_v19 = vld [vmem:[%s2223_s1 + $0xd8] sm:$0xff]  ;;  %v1633_v23 = vld [vmem:[%s2223_s1 + $0xd0] sm:$0xff] }
   0x9   :  { %986 = vmatpush.bf16.msra.mxu3 %v1637_v7  ;;  %v1608_v24 = vld [vmem:[%s2223_s1 + $0x8] sm:$0xff]  ;;  %v1607_v28 = vld [vmem:[%s2223_s1] sm:$0xff]  ;;  %v28_v35 = vld [vmem:[%s2224_s0 + $0x70] sm:$0xff] }
   0xa   :  { %930 = vmatpush.bf16.msra.mxu0 %v1612_v8  ;;  %v1616_v25 = vld [vmem:[%s2223_s1 + $0x48] sm:$0xff]  ;;  %v1615_v29 = vld [vmem:[%s2223_s1 + $0x40] sm:$0xff]  ;;  %v16_v36 = vld [vmem:[%s2224_s0 + $0x10] sm:$0xff] }
   0xb   :  { %949 = vmatpush.bf16.msra.mxu1 %v1620_v9  ;;  %v1624_v26 = vld [vmem:[%s2223_s1 + $0x88] sm:$0xff]  ;;  %v1623_v30 = vld [vmem:[%s2223_s1 + $0x80] sm:$0xff]  ;;  %v29_v37 = vld [vmem:[%s2224_s0 + $0x78] sm:$0xff] }
   0xc   :  { %968 = vmatpush.bf16.msra.mxu2 %v1628_v10  ;;  %v1632_v27 = vld [vmem:[%s2223_s1 + $0xc8] sm:$0xff]  ;;  %v1631_v31 = vld [vmem:[%s2223_s1 + $0xc0] sm:$0xff]  ;;  %v17_v38 = vld [vmem:[%s2224_s0 + $0x18] sm:$0xff]  ;;  %v68_v44 = vpack.c.bf16 %v29_v37, %v16_v36 }
   0xd   :  { %987 = vmatpush.bf16.msra.mxu3 %v1636_v11  ;;  %v14_v32 = vld [vmem:[%s2224_s0] sm:$0xff]  ;;  %v27_v33 = vld [vmem:[%s2224_s0 + $0x68] sm:$0xff]  ;;  %v1646_v40 = vld [vmem:[%s2223_s1 + $0x138] sm:$0xff] }
   0xe   :  { %931 = vmatpush.bf16.msra.mxu0 %v1611_v12  ;;  %v15_v34 = vld [vmem:[%s2224_s0 + $0x8] sm:$0xff]  ;;  %v30_v39 = vld [vmem:[%s2224_s0 + $0x80] sm:$0xff]  ;;  %v1654_v41 = vld [vmem:[%s2223_s1 + $0x178] sm:$0xff]  ;;  %v66_v42 = vpack.c.bf16 %v27_v33, %v14_v32 }
   0xf   :  { %950 = vmatpush.bf16.msra.mxu1 %v1619_v13  ;;  %v67_v43 = vpack.c.bf16 %v28_v35, %v15_v34  ;;  %v69_v45 = vpack.c.bf16 %v30_v39, %v17_v38  ;;  %v1662_v46 = vld [vmem:[%s2223_s1 + $0x1b8] sm:$0xff]  ;;  %v1645_v48 = vld [vmem:[%s2223_s1 + $0x130] sm:$0xff]  ;;  %v1644_v52 = vld [vmem:[%s2223_s1 + $0x128] sm:$0xff] }
  0x10   :  { %969 = vmatpush.bf16.msra.mxu2 %v1627_v14  ;;  %v1670_v47 = vld [vmem:[%s2223_s1 + $0x1f8] sm:$0xff]  ;;  %v1653_v49 = vld [vmem:[%s2223_s1 + $0x170] sm:$0xff]  ;;  %v1652_v53 = vld [vmem:[%s2223_s1 + $0x168] sm:$0xff] }
  0x11   :  { %988 = vmatpush.bf16.msra.mxu3 %v1635_v15  ;;  %v1661_v50 = vld [vmem:[%s2223_s1 + $0x1b0] sm:$0xff]  ;;  %v1660_v54 = vld [vmem:[%s2223_s1 + $0x1a8] sm:$0xff]  ;;  %v1643_v56 = vld [vmem:[%s2223_s1 + $0x120] sm:$0xff] }
  0x12   :  { %932 = vmatpush.bf16.msra.mxu0 %v1610_v16  ;;  %v1669_v51 = vld [vmem:[%s2223_s1 + $0x1f0] sm:$0xff]  ;;  %v1668_v55 = vld [vmem:[%s2223_s1 + $0x1e8] sm:$0xff]  ;;  %v1651_v57 = vld [vmem:[%s2223_s1 + $0x160] sm:$0xff] }
  0x13   :  { %951 = vmatpush.bf16.msra.mxu1 %v1618_v17  ;;  %v1659_v58 = vld [vmem:[%s2223_s1 + $0x1a0] sm:$0xff]  ;;  %v40_v60 = vld [vmem:[%s2224_s0 + $0xd0] sm:$0xff]  ;;  %v53_v61 = vld [vmem:[%s2224_s0 + $0x138] sm:$0xff] }
  0x14   :  { %970 = vmatpush.bf16.msra.mxu2 %v1626_v18  ;;  %v1667_v59 = vld [vmem:[%s2223_s1 + $0x1e0] sm:$0xff]  ;;  %v41_v62 = vld [vmem:[%s2224_s0 + $0xd8] sm:$0xff]  ;;  %v55_v1 = vld [vmem:[%s2224_s0 + $0x148] sm:$0xff]  ;;  %v79_v6 = vpack.c.bf16 %v53_v61, %v40_v60 }
  0x15   :  { %989 = vmatpush.bf16.msra.mxu3 %v1634_v19  ;;  %v54_v63 = vld [vmem:[%s2224_s0 + $0x140] sm:$0xff]  ;;  %v43_v2 = vld [vmem:[%s2224_s0 + $0xe8] sm:$0xff]  ;;  %v56_v3 = vld [vmem:[%s2224_s0 + $0x150] sm:$0xff] }
  0x16   :  { %933 = vmatpush.bf16.msra.mxu0 %v1609_v20  ;;  %v42_v0 = vld [vmem:[%s2224_s0 + $0xe0] sm:$0xff]  ;;  %v1642_v4 = vld [vmem:[%s2223_s1 + $0x118] sm:$0xff]  ;;  %v80_v7 = vpack.c.bf16 %v54_v63, %v41_v62  ;;  %v82_v9 = vpack.c.bf16 %v56_v3, %v43_v2  ;;  %v1641_v12 = vld [vmem:[%s2223_s1 + $0x110] sm:$0xff] }
  0x17   :  { %952 = vmatpush.bf16.msra.mxu1 %v1617_v21  ;;  %v1650_v5 = vld [vmem:[%s2223_s1 + $0x158] sm:$0xff]  ;;  %v81_v8 = vpack.c.bf16 %v55_v1, %v42_v0  ;;  %v1649_v13 = vld [vmem:[%s2223_s1 + $0x150] sm:$0xff]  ;;  %v1640_v16 = vld [vmem:[%s2223_s1 + $0x108] sm:$0xff] }
  0x18   :  { %971 = vmatpush.bf16.msra.mxu2 %v1625_v22  ;;  %v1658_v10 = vld [vmem:[%s2223_s1 + $0x198] sm:$0xff]  ;;  %v1657_v14 = vld [vmem:[%s2223_s1 + $0x190] sm:$0xff]  ;;  %v1648_v17 = vld [vmem:[%s2223_s1 + $0x148] sm:$0xff] }
  0x19   :  { %990 = vmatpush.bf16.msra.mxu3 %v1633_v23  ;;  %v1666_v11 = vld [vmem:[%s2223_s1 + $0x1d8] sm:$0xff]  ;;  %v1665_v15 = vld [vmem:[%s2223_s1 + $0x1d0] sm:$0xff]  ;;  %v1656_v18 = vld [vmem:[%s2223_s1 + $0x188] sm:$0xff] }
  0x1a   :  { %934 = vmatpush.bf16.msra.mxu0 %v1608_v24  ;;  %v1664_v19 = vld [vmem:[%s2223_s1 + $0x1c8] sm:$0xff]  ;;  %v1639_v20 = vld [vmem:[%s2223_s1 + $0x100] sm:$0xff]  ;;  %v21_v32 = vld [vmem:[%s2224_s0 + $0x38] sm:$0xff] }
  0x1b   :  { %953 = vmatpush.bf16.msra.mxu1 %v1616_v25  ;;  %v1647_v21 = vld [vmem:[%s2223_s1 + $0x140] sm:$0xff]  ;;  %v31_v25 = vld [vmem:[%s2224_s0 + $0x88] sm:$0xff]  ;;  %v1694_v34 = vld [vmem:[%s2223_s1 + $0x2b8] sm:$0xff] }
  0x1c   :  { %972 = vmatpush.bf16.msra.mxu2 %v1624_v26  ;;  %v18_v22 = vld [vmem:[%s2224_s0 + $0x20] sm:$0xff]  ;;  %v1678_v26 = vld [vmem:[%s2223_s1 + $0x238] sm:$0xff] }
  0x1d   :  { %991 = vmatpush.bf16.msra.mxu3 %v1632_v27  ;;  %v1655_v23 = vld [vmem:[%s2223_s1 + $0x180] sm:$0xff]  ;;  %v1686_v27 = vld [vmem:[%s2223_s1 + $0x278] sm:$0xff]  ;;  %v70_v36 = vpack.c.bf16 %v31_v25, %v18_v22 }
  0x1e   :  { %935 = vmatpush.bf16.msra.mxu0 %v1607_v28  ;;  %v1663_v24 = vld [vmem:[%s2223_s1 + $0x1c0] sm:$0xff]  ;;  %v19_v28 = vld [vmem:[%s2224_s0 + $0x28] sm:$0xff]  ;;  %v1702_v35 = vld [vmem:[%s2223_s1 + $0x2f8] sm:$0xff] }
  0x1f   :  { %954 = vmatpush.bf16.msra.mxu1 %v1615_v29  ;;  %v32_v29 = vld [vmem:[%s2224_s0 + $0x90] sm:$0xff]  ;;  %v34_v33 = vld [vmem:[%s2224_s0 + $0xa0] sm:$0xff]  ;;  %v1674_v60 = vld [vmem:[%s2223_s1 + $0x218] sm:$0xff] }
  0x20   :  { %973 = vmatpush.bf16.msra.mxu2 %v1623_v30  ;;  %v20_v30 = vld [vmem:[%s2224_s0 + $0x30] sm:$0xff]  ;;  %v71_v37 = vpack.c.bf16 %v32_v29, %v19_v28  ;;  %v73_v39 = vpack.c.bf16 %v34_v33, %v21_v32  ;;  %v1682_v61 = vld [vmem:[%s2223_s1 + $0x258] sm:$0xff] }
  0x21   :  { %992 = vmatpush.bf16.msra.mxu3 %v1631_v31  ;;  %936 = vmatmul.bf16.vlgmr.msra.gmra.mxu0 %v66_v42  ;;  %v33_v31 = vld [vmem:[%s2224_s0 + $0x98] sm:$0xff]  ;;  %v1693_v42 = vld [vmem:[%s2223_s1 + $0x2b0] sm:$0xff] }
  0x22   :  { %1004 = vmatpush.bf16.msrb.mxu0 %v1646_v40  ;;  %955 = vmatmul.bf16.vlgmr.msra.gmra.mxu1 %v67_v43  ;;  %v72_v38 = vpack.c.bf16 %v33_v31, %v20_v30  ;;  %v1677_v40 = vld [vmem:[%s2223_s1 + $0x230] sm:$0xff]  ;;  %v1690_v62 = vld [vmem:[%s2223_s1 + $0x298] sm:$0xff]  ;;  %v1708_v30 = vld [vmem:[%s2223_s1 + $0x328] sm:$0xff] }
  0x23   :  { %1023 = vmatpush.bf16.msrb.mxu1 %v1654_v41  ;;  %974 = vmatmul.bf16.vlgmr.msra.gmra.mxu2 %v68_v44  ;;  %v1685_v41 = vld [vmem:[%s2223_s1 + $0x270] sm:$0xff]  ;;  %v1676_v44 = vld [vmem:[%s2223_s1 + $0x228] sm:$0xff]  ;;  %v1698_v63 = vld [vmem:[%s2223_s1 + $0x2d8] sm:$0xff] }
  0x24   :  { %993 = vmatmul.bf16.vlgmr.msra.gmra.mxu3 %v69_v45  ;;  %1042 = vmatpush.bf16.msrb.mxu2 %v1662_v46  ;;  %v1701_v43 = vld [vmem:[%s2223_s1 + $0x2f0] sm:$0xff]  ;;  %v1684_v45 = vld [vmem:[%s2223_s1 + $0x268] sm:$0xff]  ;;  %v37_v22 = vld [vmem:[%s2224_s0 + $0xb8] sm:$0xff] }
  0x25   :  { %1061 = vmatpush.bf16.msrb.mxu3 %v1670_v47  ;;  %v1692_v46 = vld [vmem:[%s2223_s1 + $0x2a8] sm:$0xff]  ;;  %v1709_v29 = vld [vmem:[%s2223_s1 + $0x330] sm:$0xff]  ;;  %v1707_v31 = vld [vmem:[%s2223_s1 + $0x320] sm:$0xff] }
  0x26   :  { %1005 = vmatpush.bf16.msrb.mxu0 %v1645_v48  ;;  %v1700_v47 = vld [vmem:[%s2223_s1 + $0x2e8] sm:$0xff]  ;;  %v1675_v48 = vld [vmem:[%s2223_s1 + $0x220] sm:$0xff]  ;;  %v48_v32 = vld [vmem:[%s2224_s0 + $0x110] sm:$0xff] }
  0x27   :  { %1024 = vmatpush.bf16.msrb.mxu1 %v1653_v49  ;;  %v1683_v49 = vld [vmem:[%s2223_s1 + $0x260] sm:$0xff]  ;;  %v61_v33 = vld [vmem:[%s2224_s0 + $0x178] sm:$0xff] }
  0x28   :  { %1043 = vmatpush.bf16.msrb.mxu2 %v1661_v50  ;;  %v1691_v50 = vld [vmem:[%s2223_s1 + $0x2a0] sm:$0xff] }
  0x29   :  { %1062 = vmatpush.bf16.msrb.mxu3 %v1669_v51  ;;  %v1699_v51 = vld [vmem:[%s2223_s1 + $0x2e0] sm:$0xff] }
  0x2a   :  { %1006 = vmatpush.bf16.msrb.mxu0 %v1644_v52  ;;  %v44_v52 = vld [vmem:[%s2224_s0 + $0xf0] sm:$0xff] }
  0x2b   :  { %1025 = vmatpush.bf16.msrb.mxu1 %v1652_v53  ;;  %v57_v53 = vld [vmem:[%s2224_s0 + $0x158] sm:$0xff] }
  0x2c   :  { %1044 = vmatpush.bf16.msrb.mxu2 %v1660_v54  ;;  %v45_v54 = vld [vmem:[%s2224_s0 + $0xf8] sm:$0xff]  ;;  %v83_v0 = vpack.c.bf16 %v57_v53, %v44_v52 }
  0x2d   :  { %1063 = vmatpush.bf16.msrb.mxu3 %v1668_v55  ;;  %v58_v55 = vld [vmem:[%s2224_s0 + $0x160] sm:$0xff] }
  0x2e   :  { %1007 = vmatpush.bf16.msrb.mxu0 %v1643_v56  ;;  %v46_v56 = vld [vmem:[%s2224_s0 + $0x100] sm:$0xff]  ;;  %v84_v1 = vpack.c.bf16 %v58_v55, %v45_v54 }
  0x2f   :  { %1026 = vmatpush.bf16.msrb.mxu1 %v1651_v57  ;;  %v59_v57 = vld [vmem:[%s2224_s0 + $0x168] sm:$0xff]  ;;  %v1719_v54 = vld [vmem:[%s2225_s2] ss:$0 sm:$0xff] }
  0x30   :  { %1045 = vmatpush.bf16.msrb.mxu2 %v1659_v58  ;;  %v47_v58 = vld [vmem:[%s2224_s0 + $0x108] sm:$0xff]  ;;  %v85_v2 = vpack.c.bf16 %v59_v57, %v46_v56 }
  0x31   :  { %1064 = vmatpush.bf16.msrb.mxu3 %v1667_v59  ;;  %941 = vmatmul.bf16.gmra.mxu0 %v79_v6  ;;  %v60_v59 = vld [vmem:[%s2224_s0 + $0x170] sm:$0xff] }
  0x32   :  { %1008 = vmatpush.bf16.msrb.mxu0 %v1642_v4  ;;  %960 = vmatmul.bf16.gmra.mxu1 %v80_v7  ;;  %v86_v3 = vpack.c.bf16 %v60_v59, %v47_v58  ;;  %v1673_v4 = vld [vmem:[%s2223_s1 + $0x210] sm:$0xff] }
  0x33   :  { %1027 = vmatpush.bf16.msrb.mxu1 %v1650_v5  ;;  %979 = vmatmul.bf16.gmra.mxu2 %v81_v8  ;;  %v1681_v5 = vld [vmem:[%s2223_s1 + $0x250] sm:$0xff]  ;;  %v1672_v8 = vld [vmem:[%s2223_s1 + $0x208] sm:$0xff] }
  0x34   :  { %998 = vmatmul.bf16.gmra.mxu3 %v82_v9  ;;  %1046 = vmatpush.bf16.msrb.mxu2 %v1658_v10  ;;  %v1689_v6 = vld [vmem:[%s2223_s1 + $0x290] sm:$0xff]  ;;  %v1680_v9 = vld [vmem:[%s2223_s1 + $0x248] sm:$0xff] }
  0x35   :  { %1065 = vmatpush.bf16.msrb.mxu3 %v1666_v11  ;;  %v1697_v7 = vld [vmem:[%s2223_s1 + $0x2d0] sm:$0xff]  ;;  %v1688_v10 = vld [vmem:[%s2223_s1 + $0x288] sm:$0xff] }
  0x36   :  { %1009 = vmatpush.bf16.msrb.mxu0 %v1641_v12  ;;  %v1696_v11 = vld [vmem:[%s2223_s1 + $0x2c8] sm:$0xff]  ;;  %v1671_v12 = vld [vmem:[%s2223_s1 + $0x200] sm:$0xff] }
  0x37   :  { %1028 = vmatpush.bf16.msrb.mxu1 %v1649_v13  ;;  %v1679_v13 = vld [vmem:[%s2223_s1 + $0x240] sm:$0xff] }
  0x38   :  { %1047 = vmatpush.bf16.msrb.mxu2 %v1657_v14  ;;  %v1687_v14 = vld [vmem:[%s2223_s1 + $0x280] sm:$0xff] }
  0x39   :  { %1066 = vmatpush.bf16.msrb.mxu3 %v1665_v15  ;;  %v1695_v15 = vld [vmem:[%s2223_s1 + $0x2c0] sm:$0xff] }
  0x3a   :  { %1010 = vmatpush.bf16.msrb.mxu0 %v1640_v16  ;;  %v22_v16 = vld [vmem:[%s2224_s0 + $0x40] sm:$0xff] }
  0x3b   :  { %1029 = vmatpush.bf16.msrb.mxu1 %v1648_v17  ;;  %v35_v17 = vld [vmem:[%s2224_s0 + $0xa8] sm:$0xff] }
  0x3c   :  { %1048 = vmatpush.bf16.msrb.mxu2 %v1656_v18  ;;  %v1710_v18 = vld [vmem:[%s2223_s1 + $0x338] sm:$0xff]  ;;  %v74_v25 = vpack.c.bf16 %v35_v17, %v22_v16 }
  0x3d   :  { %1067 = vmatpush.bf16.msrb.mxu3 %v1664_v19  ;;  %v23_v19 = vld [vmem:[%s2224_s0 + $0x48] sm:$0xff] }
  0x3e   :  { %1011 = vmatpush.bf16.msrb.mxu0 %v1639_v20  ;;  %v36_v20 = vld [vmem:[%s2224_s0 + $0xb0] sm:$0xff] }
  0x3f   :  { %1030 = vmatpush.bf16.msrb.mxu1 %v1647_v21  ;;  %v24_v21 = vld [vmem:[%s2224_s0 + $0x50] sm:$0xff] }
  0x40   :  { %1049 = vmatpush.bf16.msrb.mxu2 %v1655_v23  ;;  %v25_v23 = vld [vmem:[%s2224_s0 + $0x58] sm:$0xff] }
  0x41   :  { %1068 = vmatpush.bf16.msrb.mxu3 %v1663_v24  ;;  %1012 = vmatmul.bf16.vlgmr.msrb.gmra.mxu0 %v70_v36  ;;  %v38_v24 = vld [vmem:[%s2224_s0 + $0xc0] sm:$0xff] }
  0x42   :  { %1080 = vmatpush.bf16.msra.mxu0 %v1678_v26  ;;  %1031 = vmatmul.bf16.vlgmr.msrb.gmra.mxu1 %v71_v37  ;;  %v75_v26 = vpack.c.bf16 %v36_v20, %v23_v19  ;;  %v77_v28 = vpack.c.bf16 %v38_v24, %v25_v23  ;;  %v50_v36 = vld [vmem:[%s2224_s0 + $0x120] sm:$0xff]  ;;  %v63_v37 = vld [vmem:[%s2224_s0 + $0x188] sm:$0xff] }
  0x43   :  { %1099 = vmatpush.bf16.msra.mxu1 %v1686_v27  ;;  %1050 = vmatmul.bf16.vlgmr.msrb.gmra.mxu2 %v72_v38  ;;  %v76_v27 = vpack.c.bf16 %v37_v22, %v24_v21  ;;  %v51_v38 = vld [vmem:[%s2224_s0 + $0x128] sm:$0xff] }
  0x44   :  { %1118 = vmatpush.bf16.msra.mxu2 %v1694_v34  ;;  %1069 = vmatmul.bf16.vlgmr.msrb.gmra.mxu3 %v73_v39  ;;  %v49_v34 = vld [vmem:[%s2224_s0 + $0x118] sm:$0xff]  ;;  %v64_v39 = vld [vmem:[%s2224_s0 + $0x190] sm:$0xff] }
  0x45   :  { %1137 = vmatpush.bf16.msra.mxu3 %v1702_v35  ;;  %v62_v35 = vld [vmem:[%s2224_s0 + $0x180] sm:$0xff] }
  0x46   :  { %1081 = vmatpush.bf16.msra.mxu0 %v1677_v40  ;;  %v1706_v40 = vld [vmem:[%s2223_s1 + $0x318] sm:$0xff] }
  0x47   :  { %1100 = vmatpush.bf16.msra.mxu1 %v1685_v41  ;;  %v87_v41 = vpack.c.bf16 %v61_v33, %v48_v32 }
  0x48   :  { %1119 = vmatpush.bf16.msra.mxu2 %v1693_v42  ;;  %v88_v42 = vpack.c.bf16 %v62_v35, %v49_v34 }
  0x49   :  { %1138 = vmatpush.bf16.msra.mxu3 %v1701_v43  ;;  %v89_v43 = vpack.c.bf16 %v63_v37, %v50_v36 }
  0x4a   :  { %1082 = vmatpush.bf16.msra.mxu0 %v1676_v44  ;;  %v90_v44 = vpack.c.bf16 %v64_v39, %v51_v38 }
  0x4b   :  { %1101 = vmatpush.bf16.msra.mxu1 %v1684_v45  ;;  %v1705_v45 = vld [vmem:[%s2223_s1 + $0x310] sm:$0xff] }
  0x4c   :  { %1120 = vmatpush.bf16.msra.mxu2 %v1692_v46  ;;  %v1704_v46 = vld [vmem:[%s2223_s1 + $0x308] sm:$0xff] }
  0x4d   :  { %1139 = vmatpush.bf16.msra.mxu3 %v1700_v47  ;;  %v1703_v47 = vld [vmem:[%s2223_s1 + $0x300] sm:$0xff] }
  0x4e   :  { %1083 = vmatpush.bf16.msra.mxu0 %v1675_v48  ;;  %v26_v48 = vld [vmem:[%s2224_s0 + $0x60] sm:$0xff] }
  0x4f   :  { %1102 = vmatpush.bf16.msra.mxu1 %v1683_v49  ;;  %v39_v49 = vld [vmem:[%s2224_s0 + $0xc8] sm:$0xff] }
  0x50   :  { %1121 = vmatpush.bf16.msra.mxu2 %v1691_v50  ;;  %v52_v50 = vld [vmem:[%s2224_s0 + $0x130] sm:$0xff]  ;;  %v78_v52 = vpack.c.bf16 %v39_v49, %v26_v48 }
  0x51   :  { %1140 = vmatpush.bf16.msra.mxu3 %v1699_v51  ;;  %1017 = vmatmul.bf16.gmra.mxu0 %v83_v0  ;;  %v65_v51 = vld [vmem:[%s2224_s0 + $0x198] sm:$0xff] }
  0x52   :  { %1084 = vmatpush.bf16.msra.mxu0 %v1674_v60  ;;  %1036 = vmatmul.bf16.gmra.mxu1 %v84_v1  ;;  %v91_v53 = vpack.c.bf16 %v65_v51, %v52_v50 }
  0x53   :  { %1103 = vmatpush.bf16.msra.mxu1 %v1682_v61  ;;  %1055 = vmatmul.bf16.gmra.mxu2 %v85_v2 }
  0x54   :  { %1122 = vmatpush.bf16.msra.mxu2 %v1690_v62  ;;  %1074 = vmatmul.bf16.gmra.mxu3 %v86_v3 }
  0x55   :  { %1141 = vmatpush.bf16.msra.mxu3 %v1698_v63 }
  0x56   :  { %1085 = vmatpush.bf16.msra.mxu0 %v1673_v4 }
  0x57   :  { %1104 = vmatpush.bf16.msra.mxu1 %v1681_v5 }
  0x58   :  { %1123 = vmatpush.bf16.msra.mxu2 %v1689_v6 }
  0x59   :  { %1142 = vmatpush.bf16.msra.mxu3 %v1697_v7 }
  0x5a   :  { %1086 = vmatpush.bf16.msra.mxu0 %v1672_v8 }
  0x5b   :  { %1105 = vmatpush.bf16.msra.mxu1 %v1680_v9 }
  0x5c   :  { %1124 = vmatpush.bf16.msra.mxu2 %v1688_v10 }
  0x5d   :  { %1143 = vmatpush.bf16.msra.mxu3 %v1696_v11 }
  0x5e   :  { %1087 = vmatpush.bf16.msra.mxu0 %v1671_v12 }
  0x5f   :  { %1106 = vmatpush.bf16.msra.mxu1 %v1679_v13 }
  0x60   :  { %1125 = vmatpush.bf16.msra.mxu2 %v1687_v14 }
  0x61   :  { %1144 = vmatpush.bf16.msra.mxu3 %v1695_v15  ;;  %1088 = vmatmul.bf16.vlgmr.msra.gmra.mxu0 %v74_v25 }
  0x62   :  { %1156 = vmatpush.bf16.msrb.mxu0 %v1710_v18  ;;  %1107 = vmatmul.bf16.vlgmr.msra.gmra.mxu1 %v75_v26 }
  0x63   :  { %1711 = vmatpush.bf16.msrb.mxu1 %v1710_v18  ;;  %1126 = vmatmul.bf16.vlgmr.msra.gmra.mxu2 %v76_v27 }
  0x64   :  { %1145 = vmatmul.bf16.vlgmr.msra.gmra.mxu3 %v77_v28 }
  0x66   :  { %1157 = vmatpush.bf16.msrb.mxu0 %v1709_v29 }
  0x67   :  { %1712 = vmatpush.bf16.msrb.mxu1 %v1709_v29 }
  0x6a   :  { %1158 = vmatpush.bf16.msrb.mxu0 %v1708_v30 }
  0x6b   :  { %1713 = vmatpush.bf16.msrb.mxu1 %v1708_v30 }
  0x6e   :  { %1159 = vmatpush.bf16.msrb.mxu0 %v1707_v31 }
  0x6f   :  { %1714 = vmatpush.bf16.msrb.mxu1 %v1707_v31 }
  0x71   :  { %1093 = vmatmul.bf16.gmra.mxu0 %v87_v41 }
  0x72   :  { %1160 = vmatpush.bf16.msrb.mxu0 %v1706_v40  ;;  %1112 = vmatmul.bf16.gmra.mxu1 %v88_v42 }
  0x73   :  { %1715 = vmatpush.bf16.msrb.mxu1 %v1706_v40  ;;  %1131 = vmatmul.bf16.gmra.mxu2 %v89_v43 }
  0x74   :  { %1150 = vmatmul.bf16.gmra.mxu3 %v90_v44 }
  0x76   :  { %1161 = vmatpush.bf16.msrb.mxu0 %v1705_v45 }
  0x77   :  { %1716 = vmatpush.bf16.msrb.mxu1 %v1705_v45 }
  0x7a   :  { %1162 = vmatpush.bf16.msrb.mxu0 %v1704_v46 }
  0x7b   :  { %1717 = vmatpush.bf16.msrb.mxu1 %v1704_v46 }
  0x7e   :  { %1163 = vmatpush.bf16.msrb.mxu0 %v1703_v47 }
  0x7f   :  { %1718 = vmatpush.bf16.msrb.mxu1 %v1703_v47 }
  0x81   :  { %1164 = vmatmul.bf16.vlgmr.msrb.gmra.mxu0 %v78_v52 }
  0x82   :  { %1169 = vmatmul.bf16.vlgmr.msrb.gmra.mxu1 %v91_v53 }
  0x9e   :  { %v937_v55 = vpop.f32.mrf.mxu0 }
  0x9f   :  { %v956_v56 = vpop.f32.mrf.mxu1  ;;  %v938_v57 = vadd.f32 %v1719_v54, %v937_v55 }
  0xa1   :  { %v957_v58 = vadd.f32 %v956_v56, %v938_v57 }
  0xa6   :  { %v975_v59 = vpop.f32.mrf.mxu2  ;;  %v939_v61 = vpop.f32.mrf.mxu0 }
  0xa7   :  { %v994_v60 = vpop.f32.mrf.mxu3  ;;  %v958_v62 = vpop.f32.mrf.mxu1  ;;  %v940_v63 = vadd.f32 %v1719_v54, %v939_v61  ;;  %v976_v31 = vadd.f32 %v975_v59, %v957_v58 }
  0xa9   :  { %v959_v0 = vadd.f32 %v958_v62, %v940_v63  ;;  %v995_v34 = vadd.f32 %v994_v60, %v976_v31 }
  0xae   :  { %v977_v1 = vpop.f32.mrf.mxu2  ;;  %v942_v3 = vpop.f32.mrf.mxu0 }
  0xaf   :  { %v996_v2 = vpop.f32.mrf.mxu3  ;;  %v961_v4 = vpop.f32.mrf.mxu1  ;;  %v943_v25 = vadd.f32 %v1719_v54, %v942_v3  ;;  %v978_v43 = vadd.f32 %v977_v1, %v959_v0 }
  0xb1   :  { %v962_v30 = vadd.f32 %v961_v4, %v943_v25  ;;  %v997_v47 = vadd.f32 %v996_v2, %v978_v43 }
  0xb6   :  { %v980_v5 = vpop.f32.mrf.mxu2  ;;  %v944_v7 = vpop.f32.mrf.mxu0 }
  0xb7   :  { %v999_v6 = vpop.f32.mrf.mxu3  ;;  %v963_v8 = vpop.f32.mrf.mxu1  ;;  %v981_v32 = vadd.f32 %v980_v5, %v962_v30  ;;  %v945_v33 = vadd.f32 %v1719_v54, %v944_v7 }
  0xb9   :  { %v1000_v35 = vadd.f32 %v999_v6, %v981_v32  ;;  %v964_v40 = vadd.f32 %v963_v8, %v945_v33 }
  0xbe   :  { %v982_v9 = vpop.f32.mrf.mxu2  ;;  %v1013_v11 = vpop.f32.mrf.mxu0 }
  0xbf   :  { %v1001_v10 = vpop.f32.mrf.mxu3  ;;  %v1032_v12 = vpop.f32.mrf.mxu1  ;;  %v1014_v41 = vadd.f32 %v1013_v11, %v995_v34  ;;  %v983_v44 = vadd.f32 %v982_v9, %v964_v40 }
  0xc1   :  { %v1033_v45 = vadd.f32 %v1032_v12, %v1014_v41  ;;  %v1002_v48 = vadd.f32 %v1001_v10, %v983_v44 }
  0xc6   :  { %v1051_v13 = vpop.f32.mrf.mxu2  ;;  %v1015_v15 = vpop.f32.mrf.mxu0 }
  0xc7   :  { %v1070_v14 = vpop.f32.mrf.mxu3  ;;  %v1034_v16 = vpop.f32.mrf.mxu1  ;;  %v1052_v49 = vadd.f32 %v1051_v13, %v1033_v45  ;;  %v1016_v54 = vadd.f32 %v1015_v15, %v997_v47 }
  0xc9   :  { %v1071_v57 = vadd.f32 %v1070_v14, %v1052_v49  ;;  %v1035_v59 = vadd.f32 %v1034_v16, %v1016_v54 }
  0xce   :  { %v1053_v17 = vpop.f32.mrf.mxu2  ;;  %v1018_v19 = vpop.f32.mrf.mxu0 }
  0xcf   :  { %v1072_v18 = vpop.f32.mrf.mxu3  ;;  %v1037_v20 = vpop.f32.mrf.mxu1  ;;  %v1019_v42 = vadd.f32 %v1018_v19, %v1000_v35  ;;  %v1054_v63 = vadd.f32 %v1053_v17, %v1035_v59 }
  0xd1   :  { %v1038_v46 = vadd.f32 %v1037_v20, %v1019_v42  ;;  %v1073_v6 = vadd.f32 %v1072_v18, %v1054_v63 }
  0xd6   :  { %v1056_v21 = vpop.f32.mrf.mxu2  ;;  %v1020_v23 = vpop.f32.mrf.mxu0 }
  0xd7   :  { %v1075_v22 = vpop.f32.mrf.mxu3  ;;  %v1039_v24 = vpop.f32.mrf.mxu1  ;;  %v1057_v50 = vadd.f32 %v1056_v21, %v1038_v46  ;;  %v1021_v55 = vadd.f32 %v1020_v23, %v1002_v48 }
  0xd9   :  { %v1076_v58 = vadd.f32 %v1075_v22, %v1057_v50  ;;  %v1040_v60 = vadd.f32 %v1039_v24, %v1021_v55 }
  0xde   :  { %v1058_v26 = vpop.f32.mrf.mxu2  ;;  %v1089_v28 = vpop.f32.mrf.mxu0 }
  0xdf   :  { %v1077_v27 = vpop.f32.mrf.mxu3  ;;  %v1108_v29 = vpop.f32.mrf.mxu1  ;;  %v1090_v61 = vadd.f32 %v1089_v28, %v1071_v57  ;;  %v1059_v0 = vadd.f32 %v1058_v26, %v1040_v60 }
  0xe1   :  { %v1109_v4 = vadd.f32 %v1108_v29, %v1090_v61  ;;  %v1078_v7 = vadd.f32 %v1077_v27, %v1059_v0 }
  0xe6   :  { %v1127_v36 = vpop.f32.mrf.mxu2  ;;  %v1091_v38 = vpop.f32.mrf.mxu0 }
  0xe7   :  { %v1146_v37 = vpop.f32.mrf.mxu3  ;;  %v1110_v39 = vpop.f32.mrf.mxu1  ;;  %v1128_v8 = vadd.f32 %v1127_v36, %v1109_v4  ;;  %v1092_v11 = vadd.f32 %v1091_v38, %v1073_v6 }
  0xe9   :  { %v1147_v13 = vadd.f32 %v1146_v37, %v1128_v8  ;;  %v1111_v20 = vadd.f32 %v1110_v39, %v1092_v11 }
  0xee   :  { %v1129_v51 = vpop.f32.mrf.mxu2  ;;  %v1094_v52 = vpop.f32.mrf.mxu0 }
  0xef   :  { %v1113_v53 = vpop.f32.mrf.mxu1  ;;  %v1148_v56 = vpop.f32.mrf.mxu3  ;;  %v1095_v62 = vadd.f32 %v1094_v52, %v1076_v58  ;;  %v1130_v23 = vadd.f32 %v1129_v51, %v1111_v20 }
  0xf1   :  { %v1114_v5 = vadd.f32 %v1113_v53, %v1095_v62  ;;  %v1149_v29 = vadd.f32 %v1148_v56, %v1130_v23 }
  0xf6   :  { %v1132_v1 = vpop.f32.mrf.mxu2  ;;  %v1096_v3 = vpop.f32.mrf.mxu0 }
  0xf7   :  { %v1115_v2 = vpop.f32.mrf.mxu1  ;;  %v1133_v9 = vadd.f32 %v1132_v1, %v1114_v5  ;;  %v1151_v10 = vpop.f32.mrf.mxu3  ;;  %v1097_v12 = vadd.f32 %v1096_v3, %v1078_v7 }
  0xf9   :  { %v1152_v14 = vadd.f32 %v1151_v10, %v1133_v9  ;;  %v1116_v17 = vadd.f32 %v1115_v2, %v1097_v12 }
  0xfe   :  { %v1134_v15 = vpop.f32.mrf.mxu2  ;;  %v1165_v16 = vpop.f32.mrf.mxu0 }
  0xff   :  { %v1170_v19 = vpop.f32.mrf.mxu1  ;;  %v1166_v21 = vadd.f32 %v1165_v16, %v1147_v13  ;;  %v1135_v24 = vadd.f32 %v1134_v15, %v1116_v17  ;;  %v1153_v28 = vpop.f32.mrf.mxu3 }
 0x100   :  { %v1171_v22 = vadd.f32 %v1170_v19, %v1152_v14 }
 0x101   :  { %v1175_v25 = vmul.f32 0.2, %v1166_v21  ;;  %v1154_v30 = vadd.f32 %v1153_v28, %v1135_v24 }
 0x102   :  { %v1177_v26 = vmul.f32 0.2, %v1171_v22 }
 0x103   :  { %v1179_v18 = vmax.f32 %v1166_v21, %v1175_v25 }
 0x104   :  { %v1181_v27 = vmax.f32 %v1171_v22, %v1177_v26 }
 0x105   :  { %1183 = vst [vmem:[%s2226_s3] sm:$0xff] %v1179_v18 }
 0x106   :  { %1185 = vst [vmem:[%s2226_s3 + $0x10] sm:$0xff] %v1181_v27  ;;  %v1167_v31 = vpop.f32.mrf.mxu0 }
 0x107   :  { %v1172_v32 = vpop.f32.mrf.mxu1  ;;  %v1168_v33 = vadd.f32 %v1167_v31, %v1149_v29 }
 0x108   :  { %v1173_v34 = vadd.f32 %v1172_v32, %v1154_v30 }
 0x109   :  { %v1176_v35 = vmul.f32 0.2, %v1168_v33 }
 0x10a   :  { %v1178_v36 = vmul.f32 0.2, %v1173_v34 }
 0x10b   :  { %v1180_v37 = vmax.f32 %v1168_v33, %v1176_v35 }
 0x10c   :  { %v1182_v38 = vmax.f32 %v1173_v34, %v1178_v36 }
 0x10d   :  { %1184 = vst [vmem:[%s2226_s3 + $0x8] sm:$0xff] %v1180_v37 }
 0x10e   :  { %1186 = vst [vmem:[%s2226_s3 + $0x18] sm:$0xff] %v1182_v38 }

// kernel: classifier_gan_old_forward.5
= control target key start
LH: loop header
LB: loop body
LE: loop exit
PB: predicated region body
PF: predicated region fallthrough
CT: control target
= control target key end

     0   :  { %s2888_s1 = inlined_call_operand.vmem [shape: bf16[1152,256], index: 1, kind: input, shape index: {}]   ;;  %s2889_s0 = inlined_call_operand.vmem [shape: f32[16,1152], index: 0, kind: input, shape index: {}]   ;;  %s2890_s2 = inlined_call_operand.vmem [shape: f32[1,256], index: 2, kind: input, shape index: {}]   ;;  %s2891_s3 = inlined_call_operand.vmem [shape: f32[16,256], index: 3, kind: output, shape index: {}]  }
   0x1   :  { %v1237_v0 = vld [vmem:[%s2888_s1 + $0x70] sm:$0xf]  ;;  %v1770_v1 = vld [vmem:[%s2888_s1 + $0x74] sm:$0xf0]  ;;  %v1229_v11 = vld [vmem:[%s2888_s1 + $0x60] sm:$0xf] }
   0x2   :  { %v1301_v2 = vld [vmem:[%s2888_s1 + $0xf0] sm:$0xf]  ;;  %v1238_v3 = vor.u32 %v1770_v1, %v1237_v0  ;;  %v1786_v4 = vld [vmem:[%s2888_s1 + $0xf4] sm:$0xf0]  ;;  %v1768_v13 = vld [vmem:[%s2888_s1 + $0x64] sm:$0xf0] }
   0x3   :  { %v1365_v5 = vld [vmem:[%s2888_s1 + $0x170] sm:$0xf]  ;;  %v1802_v6 = vld [vmem:[%s2888_s1 + $0x174] sm:$0xf0]  ;;  %v1302_v7 = vor.u32 %v1786_v4, %v1301_v2  ;;  %v1293_v14 = vld [vmem:[%s2888_s1 + $0xe0] sm:$0xf]  ;;  %v1230_v16 = vor.u32 %v1768_v13, %v1229_v11 }
   0x4   :  { %v1366_v8 = vor.u32 %v1802_v6, %v1365_v5  ;;  %v1429_v9 = vld [vmem:[%s2888_s1 + $0x1f0] sm:$0xf]  ;;  %v1818_v10 = vld [vmem:[%s2888_s1 + $0x1f4] sm:$0xf0]  ;;  %911 = vmatpush.bf16.msra.mxu0 %v1238_v3  ;;  %v1784_v15 = vld [vmem:[%s2888_s1 + $0xe4] sm:$0xf0] }
   0x5   :  { %v1430_v12 = vor.u32 %v1818_v10, %v1429_v9  ;;  %925 = vmatpush.bf16.msra.mxu1 %v1302_v7  ;;  %v1294_v17 = vor.u32 %v1784_v15, %v1293_v14  ;;  %v1357_v18 = vld [vmem:[%s2888_s1 + $0x160] sm:$0xf]  ;;  %v1800_v19 = vld [vmem:[%s2888_s1 + $0x164] sm:$0xf0]  ;;  %v1221_v23 = vld [vmem:[%s2888_s1 + $0x50] sm:$0xf] }
   0x6   :  { %939 = vmatpush.bf16.msra.mxu2 %v1366_v8  ;;  %v1421_v20 = vld [vmem:[%s2888_s1 + $0x1e0] sm:$0xf]  ;;  %v1358_v21 = vor.u32 %v1800_v19, %v1357_v18  ;;  %v1816_v22 = vld [vmem:[%s2888_s1 + $0x1e4] sm:$0xf0]  ;;  %v1766_v24 = vld [vmem:[%s2888_s1 + $0x54] sm:$0xf0] }
   0x7   :  { %953 = vmatpush.bf16.msra.mxu3 %v1430_v12  ;;  %v1422_v25 = vor.u32 %v1816_v22, %v1421_v20  ;;  %v1285_v26 = vld [vmem:[%s2888_s1 + $0xd0] sm:$0xf]  ;;  %v1782_v27 = vld [vmem:[%s2888_s1 + $0xd4] sm:$0xf0]  ;;  %v1222_v29 = vor.u32 %v1766_v24, %v1221_v23  ;;  %v1213_v35 = vld [vmem:[%s2888_s1 + $0x40] sm:$0xf] }
   0x8   :  { %v1349_v28 = vld [vmem:[%s2888_s1 + $0x150] sm:$0xf]  ;;  %912 = vmatpush.bf16.msra.mxu0 %v1230_v16  ;;  %v1798_v30 = vld [vmem:[%s2888_s1 + $0x154] sm:$0xf0]  ;;  %v1286_v33 = vor.u32 %v1782_v27, %v1285_v26  ;;  %v1764_v36 = vld [vmem:[%s2888_s1 + $0x44] sm:$0xf0] }
   0x9   :  { %v1413_v31 = vld [vmem:[%s2888_s1 + $0x1d0] sm:$0xf]  ;;  %v1814_v32 = vld [vmem:[%s2888_s1 + $0x1d4] sm:$0xf0]  ;;  %926 = vmatpush.bf16.msra.mxu1 %v1294_v17  ;;  %v1350_v34 = vor.u32 %v1798_v30, %v1349_v28  ;;  %v1277_v37 = vld [vmem:[%s2888_s1 + $0xc0] sm:$0xf]  ;;  %v1214_v44 = vor.u32 %v1764_v36, %v1213_v35 }
   0xa   :  { %940 = vmatpush.bf16.msra.mxu2 %v1358_v21  ;;  %v1414_v38 = vor.u32 %v1814_v32, %v1413_v31  ;;  %v1780_v39 = vld [vmem:[%s2888_s1 + $0xc4] sm:$0xf0]  ;;  %v1341_v40 = vld [vmem:[%s2888_s1 + $0x140] sm:$0xf]  ;;  %v1205_v47 = vld [vmem:[%s2888_s1 + $0x30] sm:$0xf] }
   0xb   :  { %954 = vmatpush.bf16.msra.mxu3 %v1422_v25  ;;  %v1796_v41 = vld [vmem:[%s2888_s1 + $0x144] sm:$0xf0]  ;;  %v1405_v42 = vld [vmem:[%s2888_s1 + $0x1c0] sm:$0xf]  ;;  %v1278_v45 = vor.u32 %v1780_v39, %v1277_v37  ;;  %v1762_v48 = vld [vmem:[%s2888_s1 + $0x34] sm:$0xf0] }
   0xc   :  { %v1812_v43 = vld [vmem:[%s2888_s1 + $0x1c4] sm:$0xf0]  ;;  %913 = vmatpush.bf16.msra.mxu0 %v1222_v29  ;;  %v1342_v46 = vor.u32 %v1796_v41, %v1341_v40  ;;  %v1269_v49 = vld [vmem:[%s2888_s1 + $0xb0] sm:$0xf]  ;;  %v1778_v51 = vld [vmem:[%s2888_s1 + $0xb4] sm:$0xf0]  ;;  %v1206_v56 = vor.u32 %v1762_v48, %v1205_v47 }
   0xd   :  { %927 = vmatpush.bf16.msra.mxu1 %v1286_v33  ;;  %v1406_v50 = vor.u32 %v1812_v43, %v1405_v42  ;;  %v1333_v52 = vld [vmem:[%s2888_s1 + $0x130] sm:$0xf]  ;;  %v1794_v53 = vld [vmem:[%s2888_s1 + $0x134] sm:$0xf0]  ;;  %v1270_v57 = vor.u32 %v1778_v51, %v1269_v49  ;;  %v1197_v59 = vld [vmem:[%s2888_s1 + $0x20] sm:$0xf] }
   0xe   :  { %941 = vmatpush.bf16.msra.mxu2 %v1350_v34  ;;  %v1397_v54 = vld [vmem:[%s2888_s1 + $0x1b0] sm:$0xf]  ;;  %v1810_v55 = vld [vmem:[%s2888_s1 + $0x1b4] sm:$0xf0]  ;;  %v1334_v58 = vor.u32 %v1794_v53, %v1333_v52  ;;  %v1760_v60 = vld [vmem:[%s2888_s1 + $0x24] sm:$0xf0] }
   0xf   :  { %955 = vmatpush.bf16.msra.mxu3 %v1414_v38  ;;  %v1261_v61 = vld [vmem:[%s2888_s1 + $0xa0] sm:$0xf]  ;;  %v1398_v62 = vor.u32 %v1810_v55, %v1397_v54  ;;  %v1776_v63 = vld [vmem:[%s2888_s1 + $0xa4] sm:$0xf0]  ;;  %v1198_v4 = vor.u32 %v1760_v60, %v1197_v59  ;;  %v1189_v7 = vld [vmem:[%s2888_s1 + $0x10] sm:$0xf] }
  0x10   :  { %914 = vmatpush.bf16.msra.mxu0 %v1214_v44  ;;  %v1325_v0 = vld [vmem:[%s2888_s1 + $0x120] sm:$0xf]  ;;  %v1792_v1 = vld [vmem:[%s2888_s1 + $0x124] sm:$0xf0]  ;;  %v1262_v5 = vor.u32 %v1776_v63, %v1261_v61  ;;  %v1758_v8 = vld [vmem:[%s2888_s1 + $0x14] sm:$0xf0] }
  0x11   :  { %928 = vmatpush.bf16.msra.mxu1 %v1278_v45  ;;  %v1389_v2 = vld [vmem:[%s2888_s1 + $0x1a0] sm:$0xf]  ;;  %v1808_v3 = vld [vmem:[%s2888_s1 + $0x1a4] sm:$0xf0]  ;;  %v1326_v6 = vor.u32 %v1792_v1, %v1325_v0  ;;  %v1253_v9 = vld [vmem:[%s2888_s1 + $0x90] sm:$0xf]  ;;  %v1190_v16 = vor.u32 %v1758_v8, %v1189_v7 }
  0x12   :  { %942 = vmatpush.bf16.msra.mxu2 %v1342_v46  ;;  %v1390_v10 = vor.u32 %v1808_v3, %v1389_v2  ;;  %v1774_v11 = vld [vmem:[%s2888_s1 + $0x94] sm:$0xf0]  ;;  %v1317_v12 = vld [vmem:[%s2888_s1 + $0x110] sm:$0xf]  ;;  %v1181_v17 = vld [vmem:[%s2888_s1] sm:$0xf] }
  0x13   :  { %956 = vmatpush.bf16.msra.mxu3 %v1406_v50  ;;  %v1790_v13 = vld [vmem:[%s2888_s1 + $0x114] sm:$0xf0]  ;;  %v1381_v14 = vld [vmem:[%s2888_s1 + $0x190] sm:$0xf]  ;;  %v1756_v18 = vld [vmem:[%s2888_s1 + $0x4] sm:$0xf0]  ;;  %v1254_v19 = vor.u32 %v1774_v11, %v1253_v9 }
  0x14   :  { %915 = vmatpush.bf16.msra.mxu0 %v1206_v56  ;;  %v1806_v15 = vld [vmem:[%s2888_s1 + $0x194] sm:$0xf0]  ;;  %v1318_v20 = vor.u32 %v1790_v13, %v1317_v12  ;;  %v1245_v21 = vld [vmem:[%s2888_s1 + $0x80] sm:$0xf]  ;;  %v1772_v22 = vld [vmem:[%s2888_s1 + $0x84] sm:$0xf0]  ;;  %v1182_v31 = vor.u32 %v1756_v18, %v1181_v17 }
  0x15   :  { %929 = vmatpush.bf16.msra.mxu1 %v1270_v57  ;;  %v1309_v23 = vld [vmem:[%s2888_s1 + $0x100] sm:$0xf]  ;;  %v1382_v24 = vor.u32 %v1806_v15, %v1381_v14  ;;  %v1788_v25 = vld [vmem:[%s2888_s1 + $0x104] sm:$0xf0]  ;;  %v1493_v26 = vld [vmem:[%s2888_s1 + $0x270] sm:$0xf]  ;;  %v1246_v35 = vor.u32 %v1772_v22, %v1245_v21 }
  0x16   :  { %943 = vmatpush.bf16.msra.mxu2 %v1334_v58  ;;  %v1834_v27 = vld [vmem:[%s2888_s1 + $0x274] sm:$0xf0]  ;;  %v1557_v28 = vld [vmem:[%s2888_s1 + $0x2f0] sm:$0xf]  ;;  %v1373_v33 = vld [vmem:[%s2888_s1 + $0x180] sm:$0xf]  ;;  %v1310_v36 = vor.u32 %v1788_v25, %v1309_v23 }
  0x17   :  { %957 = vmatpush.bf16.msra.mxu3 %v1398_v62  ;;  %v1850_v29 = vld [vmem:[%s2888_s1 + $0x2f4] sm:$0xf0]  ;;  %v1621_v30 = vld [vmem:[%s2888_s1 + $0x370] sm:$0xf]  ;;  %v1804_v34 = vld [vmem:[%s2888_s1 + $0x184] sm:$0xf0]  ;;  %v1494_v39 = vor.u32 %v1834_v27, %v1493_v26 }
  0x18   :  { %916 = vmatpush.bf16.msra.mxu0 %v1198_v4  ;;  %v1866_v32 = vld [vmem:[%s2888_s1 + $0x374] sm:$0xf0]  ;;  %v1685_v37 = vld [vmem:[%s2888_s1 + $0x3f0] sm:$0xf]  ;;  %v1558_v40 = vor.u32 %v1850_v29, %v1557_v28  ;;  %v1485_v41 = vld [vmem:[%s2888_s1 + $0x260] sm:$0xf]  ;;  %v1374_v44 = vor.u32 %v1804_v34, %v1373_v33 }
  0x19   :  { %930 = vmatpush.bf16.msra.mxu1 %v1262_v5  ;;  %v1882_v38 = vld [vmem:[%s2888_s1 + $0x3f4] sm:$0xf0]  ;;  %v1832_v42 = vld [vmem:[%s2888_s1 + $0x264] sm:$0xf0]  ;;  %v1622_v43 = vor.u32 %v1866_v32, %v1621_v30  ;;  %v1549_v45 = vld [vmem:[%s2888_s1 + $0x2e0] sm:$0xf] }
  0x1a   :  { %944 = vmatpush.bf16.msra.mxu2 %v1326_v6  ;;  %v1848_v46 = vld [vmem:[%s2888_s1 + $0x2e4] sm:$0xf0]  ;;  %v1613_v47 = vld [vmem:[%s2888_s1 + $0x360] sm:$0xf]  ;;  %v1686_v48 = vor.u32 %v1882_v38, %v1685_v37  ;;  %v1477_v52 = vld [vmem:[%s2888_s1 + $0x250] sm:$0xf]  ;;  %v1486_v56 = vor.u32 %v1832_v42, %v1485_v41 }
  0x1b   :  { %958 = vmatpush.bf16.msra.mxu3 %v1390_v10  ;;  %v1864_v49 = vld [vmem:[%s2888_s1 + $0x364] sm:$0xf0]  ;;  %v1677_v50 = vld [vmem:[%s2888_s1 + $0x3e0] sm:$0xf]  ;;  %v16_v55 = vld [vmem:[%s2889_s0 + $0x10] sm:$0xff]  ;;  %v1550_v57 = vor.u32 %v1848_v46, %v1549_v45 }
  0x1c   :  { %917 = vmatpush.bf16.msra.mxu0 %v1190_v16  ;;  %v1880_v51 = vld [vmem:[%s2888_s1 + $0x3e4] sm:$0xf0]  ;;  %v14_v53 = vld [vmem:[%s2889_s0] sm:$0xff]  ;;  %v1830_v58 = vld [vmem:[%s2888_s1 + $0x254] sm:$0xf0]  ;;  %v1614_v62 = vor.u32 %v1864_v49, %v1613_v47 }
  0x1d   :  { %931 = vmatpush.bf16.msra.mxu1 %v1254_v19  ;;  %v23_v54 = vld [vmem:[%s2889_s0 + $0x48] sm:$0xff]  ;;  %v1541_v59 = vld [vmem:[%s2888_s1 + $0x2d0] sm:$0xf]  ;;  %v25_v61 = vld [vmem:[%s2889_s0 + $0x58] sm:$0xff]  ;;  %v1678_v3 = vor.u32 %v1880_v51, %v1677_v50  ;;  %v1478_v11 = vor.u32 %v1830_v58, %v1477_v52 }
  0x1e   :  { %945 = vmatpush.bf16.msra.mxu2 %v1318_v20  ;;  %v2177_v60 = vpack.c.bf16 %v23_v54, %v14_v53  ;;  %v1846_v63 = vld [vmem:[%s2888_s1 + $0x2d4] sm:$0xf0]  ;;  %v1605_v0 = vld [vmem:[%s2888_s1 + $0x350] sm:$0xf]  ;;  %v2191_v2 = vpack.c.bf16 %v25_v61, %v16_v55  ;;  %v15_v5 = vld [vmem:[%s2889_s0 + $0x8] sm:$0xff] }
  0x1f   :  { %959 = vmatpush.bf16.msra.mxu3 %v1382_v24  ;;  %v1862_v1 = vld [vmem:[%s2888_s1 + $0x354] sm:$0xf0]  ;;  %v1669_v4 = vld [vmem:[%s2888_s1 + $0x3d0] sm:$0xf]  ;;  %v26_v10 = vld [vmem:[%s2889_s0 + $0x60] sm:$0xff]  ;;  %v1542_v12 = vor.u32 %v1846_v63, %v1541_v59 }
  0x20   :  { %918 = vmatpush.bf16.msra.mxu0 %v1182_v31  ;;  %v24_v6 = vld [vmem:[%s2889_s0 + $0x50] sm:$0xff]  ;;  %v1878_v7 = vld [vmem:[%s2888_s1 + $0x3d4] sm:$0xf0]  ;;  %v1469_v13 = vld [vmem:[%s2888_s1 + $0x240] sm:$0xf]  ;;  %v1606_v15 = vor.u32 %v1862_v1, %v1605_v0 }
  0x21   :  { %932 = vmatpush.bf16.msra.mxu1 %v1246_v35  ;;  %v2207_v8 = vpack.c.bf16 %v24_v6, %v15_v5  ;;  %v17_v9 = vld [vmem:[%s2889_s0 + $0x18] sm:$0xff]  ;;  %v1828_v16 = vld [vmem:[%s2888_s1 + $0x244] sm:$0xf0]  ;;  %v1533_v17 = vld [vmem:[%s2888_s1 + $0x2c0] sm:$0xf]  ;;  %v1670_v19 = vor.u32 %v1878_v7, %v1669_v4 }
  0x22   :  { %946 = vmatpush.bf16.msra.mxu2 %v1310_v36  ;;  %v2218_v14 = vpack.c.bf16 %v26_v10, %v17_v9  ;;  %v1844_v18 = vld [vmem:[%s2888_s1 + $0x2c4] sm:$0xf0]  ;;  %v1597_v20 = vld [vmem:[%s2888_s1 + $0x340] sm:$0xf]  ;;  %v1470_v24 = vor.u32 %v1828_v16, %v1469_v13  ;;  %v1461_v26 = vld [vmem:[%s2888_s1 + $0x230] sm:$0xf] }
  0x23   :  { %960 = vmatpush.bf16.msra.mxu3 %v1374_v44  ;;  %919 = vmatmul.bf16.vlgmr.msra.gmra.mxu0 %v2177_v60  ;;  %v1860_v21 = vld [vmem:[%s2888_s1 + $0x344] sm:$0xf0]  ;;  %v1661_v22 = vld [vmem:[%s2888_s1 + $0x3c0] sm:$0xf]  ;;  %v1534_v25 = vor.u32 %v1844_v18, %v1533_v17  ;;  %v1826_v28 = vld [vmem:[%s2888_s1 + $0x234] sm:$0xf0] }
  0x24   :  { %967 = vmatpush.bf16.msrb.mxu0 %v1494_v39  ;;  %933 = vmatmul.bf16.vlgmr.msra.gmra.mxu1 %v2207_v8  ;;  %v1876_v23 = vld [vmem:[%s2888_s1 + $0x3c4] sm:$0xf0]  ;;  %v1598_v27 = vor.u32 %v1860_v21, %v1597_v20  ;;  %v1525_v29 = vld [vmem:[%s2888_s1 + $0x2b0] sm:$0xf]  ;;  %v1842_v30 = vld [vmem:[%s2888_s1 + $0x2b4] sm:$0xf0]  ;;  %v1462_v36 = vor.u32 %v1826_v28, %v1461_v26 }
  0x25   :  { %981 = vmatpush.bf16.msrb.mxu1 %v1558_v40  ;;  %947 = vmatmul.bf16.vlgmr.msra.gmra.mxu2 %v2191_v2  ;;  %v1662_v31 = vor.u32 %v1876_v23, %v1661_v22  ;;  %v1589_v32 = vld [vmem:[%s2888_s1 + $0x330] sm:$0xf]  ;;  %v1858_v33 = vld [vmem:[%s2888_s1 + $0x334] sm:$0xf0]  ;;  %v1526_v37 = vor.u32 %v1842_v30, %v1525_v29  ;;  %v1453_v38 = vld [vmem:[%s2888_s1 + $0x220] sm:$0xf] }
  0x26   :  { %995 = vmatpush.bf16.msrb.mxu2 %v1622_v43  ;;  %961 = vmatmul.bf16.vlgmr.msra.gmra.mxu3 %v2218_v14  ;;  %v1653_v34 = vld [vmem:[%s2888_s1 + $0x3b0] sm:$0xf]  ;;  %v1874_v35 = vld [vmem:[%s2888_s1 + $0x3b4] sm:$0xf0]  ;;  %v1590_v39 = vor.u32 %v1858_v33, %v1589_v32  ;;  %v1824_v40 = vld [vmem:[%s2888_s1 + $0x224] sm:$0xf0] }
  0x27   :  { %1009 = vmatpush.bf16.msrb.mxu3 %v1686_v48  ;;  %v1517_v41 = vld [vmem:[%s2888_s1 + $0x2a0] sm:$0xf]  ;;  %v1840_v42 = vld [vmem:[%s2888_s1 + $0x2a4] sm:$0xf0]  ;;  %v1654_v43 = vor.u32 %v1874_v35, %v1653_v34  ;;  %v1454_v48 = vor.u32 %v1824_v40, %v1453_v38  ;;  %v1445_v50 = vld [vmem:[%s2888_s1 + $0x210] sm:$0xf] }
  0x28   :  { %968 = vmatpush.bf16.msrb.mxu0 %v1486_v56  ;;  %v1581_v44 = vld [vmem:[%s2888_s1 + $0x320] sm:$0xf]  ;;  %v1856_v45 = vld [vmem:[%s2888_s1 + $0x324] sm:$0xf0]  ;;  %v1518_v49 = vor.u32 %v1840_v42, %v1517_v41  ;;  %v1822_v51 = vld [vmem:[%s2888_s1 + $0x214] sm:$0xf0] }
  0x29   :  { %982 = vmatpush.bf16.msrb.mxu1 %v1550_v57  ;;  %v1645_v46 = vld [vmem:[%s2888_s1 + $0x3a0] sm:$0xf]  ;;  %v1872_v47 = vld [vmem:[%s2888_s1 + $0x3a4] sm:$0xf0]  ;;  %v1582_v52 = vor.u32 %v1856_v45, %v1581_v44  ;;  %v1509_v53 = vld [vmem:[%s2888_s1 + $0x290] sm:$0xf]  ;;  %v1446_v1 = vor.u32 %v1822_v51, %v1445_v50 }
  0x2a   :  { %996 = vmatpush.bf16.msrb.mxu2 %v1614_v62  ;;  %v1838_v54 = vld [vmem:[%s2888_s1 + $0x294] sm:$0xf0]  ;;  %v1573_v55 = vld [vmem:[%s2888_s1 + $0x310] sm:$0xf]  ;;  %v1646_v56 = vor.u32 %v1872_v47, %v1645_v46  ;;  %v1437_v61 = vld [vmem:[%s2888_s1 + $0x200] sm:$0xf] }
  0x2b   :  { %1010 = vmatpush.bf16.msrb.mxu3 %v1678_v3  ;;  %v1854_v57 = vld [vmem:[%s2888_s1 + $0x314] sm:$0xf0]  ;;  %v1637_v58 = vld [vmem:[%s2888_s1 + $0x390] sm:$0xf]  ;;  %v1820_v62 = vld [vmem:[%s2888_s1 + $0x204] sm:$0xf0]  ;;  %v1510_v3 = vor.u32 %v1838_v54, %v1509_v53 }
  0x2c   :  { %969 = vmatpush.bf16.msrb.mxu0 %v1478_v11  ;;  %v1870_v59 = vld [vmem:[%s2888_s1 + $0x394] sm:$0xf0]  ;;  %v1501_v63 = vld [vmem:[%s2888_s1 + $0x280] sm:$0xf]  ;;  %v1836_v0 = vld [vmem:[%s2888_s1 + $0x284] sm:$0xf0]  ;;  %v1574_v7 = vor.u32 %v1854_v57, %v1573_v55  ;;  %v1438_v20 = vor.u32 %v1820_v62, %v1437_v61 }
  0x2d   :  { %983 = vmatpush.bf16.msrb.mxu1 %v1542_v12  ;;  %v1565_v4 = vld [vmem:[%s2888_s1 + $0x300] sm:$0xf]  ;;  %v1852_v5 = vld [vmem:[%s2888_s1 + $0x304] sm:$0xf0]  ;;  %v1749_v6 = vld [vmem:[%s2888_s1 + $0x470] sm:$0xf]  ;;  %v1638_v12 = vor.u32 %v1870_v59, %v1637_v58  ;;  %v1502_v21 = vor.u32 %v1836_v0, %v1501_v63 }
  0x2e   :  { %997 = vmatpush.bf16.msrb.mxu2 %v1606_v15  ;;  %v1898_v9 = vld [vmem:[%s2888_s1 + $0x474] sm:$0xf0]  ;;  %v1769_v10 = vld [vmem:[%s2888_s1 + $0x74] sm:$0xf]  ;;  %v1239_v11 = vld [vmem:[%s2888_s1 + $0x78] sm:$0xf0] }
  0x2f   :  { %1011 = vmatpush.bf16.msrb.mxu3 %v1670_v19  ;;  %v1785_v13 = vld [vmem:[%s2888_s1 + $0xf4] sm:$0xf]  ;;  %v1303_v15 = vld [vmem:[%s2888_s1 + $0xf8] sm:$0xf0]  ;;  %v1629_v16 = vld [vmem:[%s2888_s1 + $0x380] sm:$0xf]  ;;  %v1750_v26 = vor.u32 %v1898_v9, %v1749_v6  ;;  %v1242_v30 = vor.u32 %v1769_v10, %v1239_v11 }
  0x30   :  { %970 = vmatpush.bf16.msrb.mxu0 %v1470_v24  ;;  %v1868_v17 = vld [vmem:[%s2888_s1 + $0x384] sm:$0xf0]  ;;  %v18_v18 = vld [vmem:[%s2889_s0 + $0x20] sm:$0xff]  ;;  %v20_v22 = vld [vmem:[%s2889_s0 + $0x30] sm:$0xff] }
  0x31   :  { %984 = vmatpush.bf16.msrb.mxu1 %v1534_v25  ;;  %v27_v19 = vld [vmem:[%s2889_s0 + $0x68] sm:$0xff]  ;;  %v29_v23 = vld [vmem:[%s2889_s0 + $0x78] sm:$0xff]  ;;  %v1801_v24 = vld [vmem:[%s2888_s1 + $0x174] sm:$0xf]  ;;  %v1566_v25 = vor.u32 %v1852_v5, %v1565_v4  ;;  %v1630_v35 = vor.u32 %v1868_v17, %v1629_v16 }
  0x32   :  { %998 = vmatpush.bf16.msrb.mxu2 %v1598_v27  ;;  %v1367_v27 = vld [vmem:[%s2888_s1 + $0x178] sm:$0xf0]  ;;  %v19_v28 = vld [vmem:[%s2889_s0 + $0x28] sm:$0xff]  ;;  %v28_v29 = vld [vmem:[%s2889_s0 + $0x70] sm:$0xff]  ;;  %v2401_v40 = vpack.c.bf16 %v29_v23, %v20_v22 }
  0x33   :  { %1012 = vmatpush.bf16.msrb.mxu3 %v1662_v31  ;;  %v1306_v31 = vor.u32 %v1785_v13, %v1303_v15  ;;  %v21_v32 = vld [vmem:[%s2889_s0 + $0x38] sm:$0xff]  ;;  %v1741_v33 = vld [vmem:[%s2888_s1 + $0x460] sm:$0xf]  ;;  %v1896_v34 = vld [vmem:[%s2888_s1 + $0x464] sm:$0xf0]  ;;  %v1370_v41 = vor.u32 %v1801_v24, %v1367_v27  ;;  %v2409_v44 = vpack.c.bf16 %v28_v29, %v19_v28 }
  0x34   :  { %971 = vmatpush.bf16.msrb.mxu0 %v1462_v36  ;;  %v2390_v36 = vpack.c.bf16 %v27_v19, %v18_v18  ;;  %v1767_v38 = vld [vmem:[%s2888_s1 + $0x64] sm:$0xf]  ;;  %v1742_v45 = vor.u32 %v1896_v34, %v1741_v33  ;;  %v1359_v47 = vld [vmem:[%s2888_s1 + $0x168] sm:$0xf0]  ;;  %v1733_v50 = vld [vmem:[%s2888_s1 + $0x450] sm:$0xf] }
  0x35   :  { %985 = vmatpush.bf16.msrb.mxu1 %v1526_v37  ;;  %v30_v37 = vld [vmem:[%s2889_s0 + $0x80] sm:$0xff]  ;;  %v1894_v51 = vld [vmem:[%s2888_s1 + $0x454] sm:$0xf0]  ;;  %v1765_v53 = vld [vmem:[%s2888_s1 + $0x54] sm:$0xf] }
  0x36   :  { %999 = vmatpush.bf16.msrb.mxu2 %v1590_v39  ;;  %v1231_v39 = vld [vmem:[%s2888_s1 + $0x68] sm:$0xf0]  ;;  %v1783_v42 = vld [vmem:[%s2888_s1 + $0xe4] sm:$0xf]  ;;  %v1223_v54 = vld [vmem:[%s2888_s1 + $0x58] sm:$0xf0]  ;;  %v1734_v58 = vor.u32 %v1894_v51, %v1733_v50 }
  0x37   :  { %1013 = vmatpush.bf16.msrb.mxu3 %v1654_v43  ;;  %v1295_v43 = vld [vmem:[%s2888_s1 + $0xe8] sm:$0xf0]  ;;  %v1799_v46 = vld [vmem:[%s2888_s1 + $0x164] sm:$0xf]  ;;  %v1287_v57 = vld [vmem:[%s2888_s1 + $0xd8] sm:$0xf0]  ;;  %v1226_v62 = vor.u32 %v1765_v53, %v1223_v54 }
  0x38   :  { %972 = vmatpush.bf16.msrb.mxu0 %v1454_v48  ;;  %v2417_v48 = vpack.c.bf16 %v30_v37, %v21_v32  ;;  %v1362_v55 = vor.u32 %v1799_v46, %v1359_v47  ;;  %v1797_v59 = vld [vmem:[%s2888_s1 + $0x154] sm:$0xf]  ;;  %v1351_v61 = vld [vmem:[%s2888_s1 + $0x158] sm:$0xf0]  ;;  %v1725_v63 = vld [vmem:[%s2888_s1 + $0x440] sm:$0xf] }
  0x39   :  { %986 = vmatpush.bf16.msrb.mxu1 %v1518_v49  ;;  %v1234_v49 = vor.u32 %v1767_v38, %v1231_v39  ;;  %v1892_v0 = vld [vmem:[%s2888_s1 + $0x444] sm:$0xf0]  ;;  %v1215_v4 = vld [vmem:[%s2888_s1 + $0x48] sm:$0xf0]  ;;  %v1354_v5 = vor.u32 %v1797_v59, %v1351_v61  ;;  %v1779_v6 = vld [vmem:[%s2888_s1 + $0xc4] sm:$0xf] }
  0x3a   :  { %1000 = vmatpush.bf16.msrb.mxu2 %v1582_v52  ;;  %v1298_v52 = vor.u32 %v1783_v42, %v1295_v43  ;;  %v1726_v9 = vor.u32 %v1892_v0, %v1725_v63  ;;  %v1795_v10 = vld [vmem:[%s2888_s1 + $0x144] sm:$0xf]  ;;  %v1343_v11 = vld [vmem:[%s2888_s1 + $0x148] sm:$0xf0]  ;;  %v1717_v13 = vld [vmem:[%s2888_s1 + $0x430] sm:$0xf] }
  0x3b   :  { %1014 = vmatpush.bf16.msrb.mxu3 %v1646_v56  ;;  %v1781_v56 = vld [vmem:[%s2888_s1 + $0xd4] sm:$0xf]  ;;  %v1890_v15 = vld [vmem:[%s2888_s1 + $0x434] sm:$0xf0]  ;;  %v1207_v18 = vld [vmem:[%s2888_s1 + $0x38] sm:$0xf0]  ;;  %v1346_v19 = vor.u32 %v1795_v10, %v1343_v11 }
  0x3c   :  { %973 = vmatpush.bf16.msrb.mxu0 %v1446_v1  ;;  %v1290_v1 = vor.u32 %v1781_v56, %v1287_v57  ;;  %v1761_v17 = vld [vmem:[%s2888_s1 + $0x34] sm:$0xf]  ;;  %v1718_v22 = vor.u32 %v1890_v15, %v1717_v13  ;;  %v1335_v24 = vld [vmem:[%s2888_s1 + $0x138] sm:$0xf0]  ;;  %v1888_v27 = vld [vmem:[%s2888_s1 + $0x424] sm:$0xf0] }
  0x3d   :  { %987 = vmatpush.bf16.msrb.mxu1 %v1510_v3  ;;  %v1763_v3 = vld [vmem:[%s2888_s1 + $0x44] sm:$0xf]  ;;  %v1793_v23 = vld [vmem:[%s2888_s1 + $0x134] sm:$0xf]  ;;  %v1263_v33 = vld [vmem:[%s2888_s1 + $0xa8] sm:$0xf0] }
  0x3e   :  { %1001 = vmatpush.bf16.msrb.mxu2 %v1574_v7  ;;  %v1279_v7 = vld [vmem:[%s2888_s1 + $0xc8] sm:$0xf0]  ;;  %v1759_v29 = vld [vmem:[%s2888_s1 + $0x24] sm:$0xf]  ;;  %v1701_v39 = vld [vmem:[%s2888_s1 + $0x410] sm:$0xf] }
  0x3f   :  { %1015 = vmatpush.bf16.msrb.mxu3 %v1638_v12  ;;  %v1218_v12 = vor.u32 %v1763_v3, %v1215_v4  ;;  %v1282_v16 = vor.u32 %v1779_v6, %v1279_v7  ;;  %v1775_v32 = vld [vmem:[%s2888_s1 + $0xa4] sm:$0xf]  ;;  %v1327_v37 = vld [vmem:[%s2888_s1 + $0x128] sm:$0xf0]  ;;  %v1757_v43 = vld [vmem:[%s2888_s1 + $0x14] sm:$0xf] }
  0x40   :  { %974 = vmatpush.bf16.msrb.mxu0 %v1438_v20  ;;  %v1777_v20 = vld [vmem:[%s2888_s1 + $0xb4] sm:$0xf]  ;;  %v1266_v42 = vor.u32 %v1775_v32, %v1263_v33  ;;  %v1319_v51 = vld [vmem:[%s2888_s1 + $0x118] sm:$0xf0]  ;;  %v1693_v53 = vld [vmem:[%s2888_s1 + $0x400] sm:$0xf] }
  0x41   :  { %988 = vmatpush.bf16.msrb.mxu1 %v1502_v21  ;;  %v1271_v21 = vld [vmem:[%s2888_s1 + $0xb8] sm:$0xf0]  ;;  %v1773_v46 = vld [vmem:[%s2888_s1 + $0x94] sm:$0xf]  ;;  %v1884_v54 = vld [vmem:[%s2888_s1 + $0x404] sm:$0xf0] }
  0x42   :  { %1002 = vmatpush.bf16.msrb.mxu2 %v1566_v25  ;;  %v1210_v25 = vor.u32 %v1761_v17, %v1207_v18  ;;  %v1274_v28 = vor.u32 %v1777_v20, %v1271_v21  ;;  %v1789_v50 = vld [vmem:[%s2888_s1 + $0x114] sm:$0xf]  ;;  %v1183_v57 = vld [vmem:[%s2888_s1 + $0x8] sm:$0xf0]  ;;  %v1431_v63 = vld [vmem:[%s2888_s1 + $0x1f8] sm:$0xf0]  ;;  %v1694_v6 = vor.u32 %v1884_v54, %v1693_v53 }
  0x43   :  { %1016 = vmatpush.bf16.msrb.mxu3 %v1630_v35  ;;  %975 = vmatmul.bf16.vlgmr.msrb.gmra.mxu0 %v2390_v36  ;;  %v1791_v35 = vld [vmem:[%s2888_s1 + $0x124] sm:$0xf]  ;;  %v1247_v59 = vld [vmem:[%s2888_s1 + $0x88] sm:$0xf0]  ;;  %v1833_v0 = vld [vmem:[%s2888_s1 + $0x274] sm:$0xf] }
  0x44   :  { %1023 = vmatpush.bf16.msra.mxu0 %v1750_v26  ;;  %989 = vmatmul.bf16.vlgmr.msrb.gmra.mxu1 %v2409_v44  ;;  %v1709_v26 = vld [vmem:[%s2888_s1 + $0x420] sm:$0xf]  ;;  %v1330_v47 = vor.u32 %v1791_v35, %v1327_v37  ;;  %v1495_v3 = vld [vmem:[%s2888_s1 + $0x278] sm:$0xf0]  ;;  %v1849_v4 = vld [vmem:[%s2888_s1 + $0x2f4] sm:$0xf] }
  0x45   :  { %1037 = vmatpush.bf16.msra.mxu1 %v1242_v30  ;;  %1003 = vmatmul.bf16.vlgmr.msrb.gmra.mxu2 %v2401_v40  ;;  %v1199_v30 = vld [vmem:[%s2888_s1 + $0x28] sm:$0xf0]  ;;  %v1710_v34 = vor.u32 %v1888_v27, %v1709_v26  ;;  %v1787_v7 = vld [vmem:[%s2888_s1 + $0x104] sm:$0xf]  ;;  %v1865_v15 = vld [vmem:[%s2888_s1 + $0x374] sm:$0xf]  ;;  %v1498_v18 = vor.u32 %v1833_v0, %v1495_v3 }
  0x46   :  { %1051 = vmatpush.bf16.msra.mxu2 %v1306_v31  ;;  %1017 = vmatmul.bf16.vlgmr.msrb.gmra.mxu3 %v2417_v48  ;;  %v1338_v31 = vor.u32 %v1793_v23, %v1335_v24  ;;  %v1202_v38 = vor.u32 %v1759_v29, %v1199_v30  ;;  %v22_v10 = vld [vmem:[%s2889_s0 + $0x40] sm:$0xff]  ;;  %v31_v13 = vld [vmem:[%s2889_s0 + $0x88] sm:$0xff]  ;;  %v1813_v33 = vld [vmem:[%s2888_s1 + $0x1d4] sm:$0xf] }
  0x47   :  { %1065 = vmatpush.bf16.msra.mxu3 %v1370_v41  ;;  %v1886_v41 = vld [vmem:[%s2888_s1 + $0x414] sm:$0xf0]  ;;  %v1423_v20 = vld [vmem:[%s2888_s1 + $0x1e8] sm:$0xf0]  ;;  %v1831_v23 = vld [vmem:[%s2888_s1 + $0x264] sm:$0xf] }
  0x48   :  { %1024 = vmatpush.bf16.msra.mxu0 %v1742_v45  ;;  %v1191_v45 = vld [vmem:[%s2888_s1 + $0x18] sm:$0xf0]  ;;  %v1487_v24 = vld [vmem:[%s2888_s1 + $0x268] sm:$0xf0]  ;;  %v1847_v27 = vld [vmem:[%s2888_s1 + $0x2e4] sm:$0xf] }
  0x49   :  { %1038 = vmatpush.bf16.msra.mxu1 %v1234_v49  ;;  %v1255_v49 = vld [vmem:[%s2888_s1 + $0x98] sm:$0xf0]  ;;  %v1194_v56 = vor.u32 %v1757_v43, %v1191_v45  ;;  %v1863_v30 = vld [vmem:[%s2888_s1 + $0x364] sm:$0xf]  ;;  %v1490_v32 = vor.u32 %v1831_v23, %v1487_v24  ;;  %v1829_v37 = vld [vmem:[%s2888_s1 + $0x254] sm:$0xf] }
  0x4a   :  { %1052 = vmatpush.bf16.msra.mxu2 %v1298_v52  ;;  %v1702_v52 = vor.u32 %v1886_v41, %v1701_v39  ;;  %v1258_v61 = vor.u32 %v1773_v46, %v1255_v49  ;;  %v1845_v41 = vld [vmem:[%s2888_s1 + $0x2d4] sm:$0xf]  ;;  %v1607_v46 = vld [vmem:[%s2888_s1 + $0x358] sm:$0xf0]  ;;  %v1811_v49 = vld [vmem:[%s2888_s1 + $0x1c4] sm:$0xf] }
  0x4b   :  { %1066 = vmatpush.bf16.msra.mxu3 %v1362_v55  ;;  %v1755_v55 = vld [vmem:[%s2888_s1 + $0x4] sm:$0xf]  ;;  %v1861_v45 = vld [vmem:[%s2888_s1 + $0x354] sm:$0xf]  ;;  %v1527_v3 = vld [vmem:[%s2888_s1 + $0x2b8] sm:$0xf0] }
  0x4c   :  { %1025 = vmatpush.bf16.msra.mxu0 %v1734_v58  ;;  %v1771_v58 = vld [vmem:[%s2888_s1 + $0x84] sm:$0xf]  ;;  %v1186_v11 = vor.u32 %v1755_v55, %v1183_v57  ;;  %v1610_v53 = vor.u32 %v1861_v45, %v1607_v46  ;;  %v1383_v23 = vld [vmem:[%s2888_s1 + $0x198] sm:$0xf0] }
  0x4d   :  { %1039 = vmatpush.bf16.msra.mxu1 %v1226_v62  ;;  %v1817_v62 = vld [vmem:[%s2888_s1 + $0x1f4] sm:$0xf]  ;;  %v1250_v17 = vor.u32 %v1771_v58, %v1247_v59  ;;  %v1843_v54 = vld [vmem:[%s2888_s1 + $0x2c4] sm:$0xf]  ;;  %v1399_v59 = vld [vmem:[%s2888_s1 + $0x1b8] sm:$0xf0] }
  0x4e   :  { %1053 = vmatpush.bf16.msra.mxu2 %v1290_v1  ;;  %v1322_v1 = vor.u32 %v1789_v50, %v1319_v51  ;;  %v1407_v50 = vld [vmem:[%s2888_s1 + $0x1c8] sm:$0xf0]  ;;  %v1809_v58 = vld [vmem:[%s2888_s1 + $0x1b4] sm:$0xf]  ;;  %v1687_v45 = vld [vmem:[%s2888_s1 + $0x3f8] sm:$0xf0] }
  0x4f   :  { %1067 = vmatpush.bf16.msra.mxu3 %v1354_v5  ;;  %v1559_v5 = vld [vmem:[%s2888_s1 + $0x2f8] sm:$0xf0]  ;;  %v1410_v55 = vor.u32 %v1811_v49, %v1407_v50  ;;  %v1897_v49 = vld [vmem:[%s2888_s1 + $0x474] sm:$0xf] }
  0x50   :  { %1026 = vmatpush.bf16.msra.mxu0 %v1726_v9  ;;  %v1311_v9 = vld [vmem:[%s2888_s1 + $0x108] sm:$0xf0]  ;;  %v1562_v21 = vor.u32 %v1849_v4, %v1559_v5  ;;  %v1402_v4 = vor.u32 %v1809_v58, %v1399_v59  ;;  %v1857_v5 = vld [vmem:[%s2888_s1 + $0x334] sm:$0xf]  ;;  %v1751_v50 = vld [vmem:[%s2888_s1 + $0x478] sm:$0xf0] }
  0x51   :  { %1040 = vmatpush.bf16.msra.mxu1 %v1218_v12  ;;  %v1434_v12 = vor.u32 %v1817_v62, %v1431_v63  ;;  %v1825_v62 = vld [vmem:[%s2888_s1 + $0x234] sm:$0xf]  ;;  %v1463_v63 = vld [vmem:[%s2888_s1 + $0x238] sm:$0xf0]  ;;  %v1895_v58 = vld [vmem:[%s2888_s1 + $0x464] sm:$0xf] }
  0x52   :  { %1054 = vmatpush.bf16.msra.mxu2 %v1282_v16  ;;  %v1623_v16 = vld [vmem:[%s2888_s1 + $0x378] sm:$0xf0]  ;;  %v1743_v59 = vld [vmem:[%s2888_s1 + $0x468] sm:$0xf0] }
  0x53   :  { %1068 = vmatpush.bf16.msra.mxu3 %v1346_v19  ;;  %v1815_v19 = vld [vmem:[%s2888_s1 + $0x1e4] sm:$0xf]  ;;  %v1626_v26 = vor.u32 %v1865_v15, %v1623_v16 }
  0x54   :  { %1027 = vmatpush.bf16.msra.mxu0 %v1718_v22  ;;  %v1314_v22 = vor.u32 %v1787_v7, %v1311_v9  ;;  %v1426_v29 = vor.u32 %v1815_v19, %v1423_v20  ;;  %v1466_v7 = vor.u32 %v1825_v62, %v1463_v63  ;;  %v1807_v9 = vld [vmem:[%s2888_s1 + $0x1a4] sm:$0xf]  ;;  %v1583_v20 = vld [vmem:[%s2888_s1 + $0x328] sm:$0xf0]  ;;  %v1746_v62 = vor.u32 %v1895_v58, %v1743_v59  ;;  %v1877_v63 = vld [vmem:[%s2888_s1 + $0x3d4] sm:$0xf] }
  0x55   :  { %1041 = vmatpush.bf16.msra.mxu1 %v1210_v25  ;;  %v2609_v25 = vpack.c.bf16 %v31_v13, %v22_v10  ;;  %v1391_v10 = vld [vmem:[%s2888_s1 + $0x1a8] sm:$0xf0]  ;;  %v1839_v16 = vld [vmem:[%s2888_s1 + $0x2a4] sm:$0xf] }
  0x56   :  { %1055 = vmatpush.bf16.msra.mxu2 %v1274_v28  ;;  %v1551_v28 = vld [vmem:[%s2888_s1 + $0x2e8] sm:$0xf0]  ;;  %v1855_v19 = vld [vmem:[%s2888_s1 + $0x324] sm:$0xf] }
  0x57   :  { %1069 = vmatpush.bf16.msra.mxu3 %v1338_v31  ;;  %v1615_v31 = vld [vmem:[%s2888_s1 + $0x368] sm:$0xf0]  ;;  %v1554_v35 = vor.u32 %v1847_v27, %v1551_v28  ;;  %v1447_v27 = vld [vmem:[%s2888_s1 + $0x218] sm:$0xf0]  ;;  %v1586_v28 = vor.u32 %v1855_v19, %v1583_v20 }
  0x58   :  { %1028 = vmatpush.bf16.msra.mxu0 %v1710_v34  ;;  %v1415_v34 = vld [vmem:[%s2888_s1 + $0x1d8] sm:$0xf0]  ;;  %v1618_v39 = vor.u32 %v1863_v30, %v1615_v31  ;;  %v1455_v13 = vld [vmem:[%s2888_s1 + $0x228] sm:$0xf0] }
  0x59   :  { %1042 = vmatpush.bf16.msra.mxu1 %v1202_v38  ;;  %v1479_v38 = vld [vmem:[%s2888_s1 + $0x258] sm:$0xf0]  ;;  %v1418_v43 = vor.u32 %v1813_v33, %v1415_v34  ;;  %v1803_v34 = vld [vmem:[%s2888_s1 + $0x184] sm:$0xf]  ;;  %v1711_v19 = vld [vmem:[%s2888_s1 + $0x428] sm:$0xf0] }
  0x5a   :  { %1056 = vmatpush.bf16.msra.mxu2 %v1266_v42  ;;  %v1543_v42 = vld [vmem:[%s2888_s1 + $0x2d8] sm:$0xf0] }
  0x5b   :  { %1070 = vmatpush.bf16.msra.mxu3 %v1330_v47  ;;  %v1482_v47 = vor.u32 %v1829_v37, %v1479_v38  ;;  %v1546_v51 = vor.u32 %v1845_v41, %v1543_v42  ;;  %v1511_v30 = vld [vmem:[%s2888_s1 + $0x298] sm:$0xf0]  ;;  %v1375_v37 = vld [vmem:[%s2888_s1 + $0x188] sm:$0xf0]  ;;  %v1819_v38 = vld [vmem:[%s2888_s1 + $0x204] sm:$0xf] }
  0x5c   :  { %1029 = vmatpush.bf16.msra.mxu0 %v1702_v52  ;;  %v1827_v52 = vld [vmem:[%s2888_s1 + $0x244] sm:$0xf]  ;;  %v1575_v33 = vld [vmem:[%s2888_s1 + $0x318] sm:$0xf0] }
  0x5d   :  { %1043 = vmatpush.bf16.msra.mxu1 %v1194_v56  ;;  %v1859_v56 = vld [vmem:[%s2888_s1 + $0x344] sm:$0xf] }
  0x5e   :  { %1057 = vmatpush.bf16.msra.mxu2 %v1258_v61  ;;  %v1835_v42 = vld [vmem:[%s2888_s1 + $0x284] sm:$0xf] }
  0x5f   :  { %1071 = vmatpush.bf16.msra.mxu3 %v1322_v1  ;;  %v1841_v1 = vld [vmem:[%s2888_s1 + $0x2b4] sm:$0xf] }
  0x60   :  { %1030 = vmatpush.bf16.msra.mxu0 %v1694_v6  ;;  %v1591_v6 = vld [vmem:[%s2888_s1 + $0x338] sm:$0xf0] }
  0x61   :  { %1044 = vmatpush.bf16.msra.mxu1 %v1186_v11  ;;  %v1530_v11 = vor.u32 %v1841_v1, %v1527_v3  ;;  %v1594_v15 = vor.u32 %v1857_v5, %v1591_v6  ;;  %v1893_v1 = vld [vmem:[%s2888_s1 + $0x454] sm:$0xf]  ;;  %v1735_v3 = vld [vmem:[%s2888_s1 + $0x458] sm:$0xf0]  ;;  %v1663_v6 = vld [vmem:[%s2888_s1 + $0x3c8] sm:$0xf0] }
  0x62   :  { %1058 = vmatpush.bf16.msra.mxu2 %v1250_v17  ;;  %v1519_v17 = vld [vmem:[%s2888_s1 + $0x2a8] sm:$0xf0]  ;;  %v1738_v5 = vor.u32 %v1893_v1, %v1735_v3 }
  0x63   :  { %1072 = vmatpush.bf16.msra.mxu3 %v1314_v22  ;;  %1031 = vmatmul.bf16.vlgmr.msra.gmra.mxu0 %v2609_v25  ;;  %v1805_v22 = vld [vmem:[%s2888_s1 + $0x194] sm:$0xf]  ;;  %v1522_v24 = vor.u32 %v1839_v16, %v1519_v17  ;;  %v1871_v16 = vld [vmem:[%s2888_s1 + $0x3a4] sm:$0xf]  ;;  %v1647_v17 = vld [vmem:[%s2888_s1 + $0x3a8] sm:$0xf0] }
  0x64   :  { %1079 = vmatpush.bf16.msrb.mxu0 %v1434_v12  ;;  %1045 = vmatmul.bf16.vlgmr.msra.gmra.mxu1 %v2177_v60  ;;  %v1599_v60 = vld [vmem:[%s2888_s1 + $0x348] sm:$0xf0]  ;;  %v1823_v12 = vld [vmem:[%s2888_s1 + $0x224] sm:$0xf]  ;;  %v1386_v31 = vor.u32 %v1805_v22, %v1383_v23  ;;  %v1650_v20 = vor.u32 %v1871_v16, %v1647_v17  ;;  %v1869_v22 = vld [vmem:[%s2888_s1 + $0x394] sm:$0xf] }
  0x65   :  { %1093 = vmatpush.bf16.msrb.mxu1 %v1498_v18  ;;  %1059 = vmatmul.bf16.vlgmr.msra.gmra.mxu2 %v2207_v8  ;;  %v1471_v8 = vld [vmem:[%s2888_s1 + $0x248] sm:$0xf0]  ;;  %v1602_v0 = vor.u32 %v1859_v56, %v1599_v60  ;;  %v1394_v18 = vor.u32 %v1807_v9, %v1391_v10  ;;  %v1879_v56 = vld [vmem:[%s2888_s1 + $0x3e4] sm:$0xf]  ;;  %v1873_v9 = vld [vmem:[%s2888_s1 + $0x3b4] sm:$0xf] }
  0x66   :  { %1107 = vmatpush.bf16.msrb.mxu2 %v1562_v21  ;;  %1073 = vmatmul.bf16.vlgmr.msra.gmra.mxu3 %v2191_v2  ;;  %v1535_v2 = vld [vmem:[%s2888_s1 + $0x2c8] sm:$0xf0]  ;;  %v1474_v57 = vor.u32 %v1827_v52, %v1471_v8  ;;  %v1458_v21 = vor.u32 %v1823_v12, %v1455_v13  ;;  %v1851_v52 = vld [vmem:[%s2888_s1 + $0x304] sm:$0xf]  ;;  %v1655_v10 = vld [vmem:[%s2888_s1 + $0x3b8] sm:$0xf0] }
  0x67   :  { %1121 = vmatpush.bf16.msrb.mxu3 %v1626_v26  ;;  %v1538_v61 = vor.u32 %v1843_v54, %v1535_v2  ;;  %v1821_v26 = vld [vmem:[%s2888_s1 + $0x214] sm:$0xf]  ;;  %v1567_v8 = vld [vmem:[%s2888_s1 + $0x308] sm:$0xf0]  ;;  %v1719_v12 = vld [vmem:[%s2888_s1 + $0x438] sm:$0xf0]  ;;  %v1658_v13 = vor.u32 %v1873_v9, %v1655_v10 }
  0x68   :  { %1080 = vmatpush.bf16.msrb.mxu0 %v1426_v29  ;;  %v1837_v29 = vld [vmem:[%s2888_s1 + $0x294] sm:$0xf]  ;;  %v1679_v60 = vld [vmem:[%s2888_s1 + $0x3e8] sm:$0xf0]  ;;  %v1639_v23 = vld [vmem:[%s2888_s1 + $0x398] sm:$0xf0] }
  0x69   :  { %1094 = vmatpush.bf16.msrb.mxu1 %v1490_v32  ;;  %v1853_v32 = vld [vmem:[%s2888_s1 + $0x314] sm:$0xf]  ;;  %v1514_v41 = vor.u32 %v1837_v29, %v1511_v30  ;;  %v1867_v29 = vld [vmem:[%s2888_s1 + $0x384] sm:$0xf]  ;;  %v1631_v30 = vld [vmem:[%s2888_s1 + $0x388] sm:$0xf0] }
  0x6a   :  { %1108 = vmatpush.bf16.msrb.mxu2 %v1554_v35  ;;  %v1450_v35 = vor.u32 %v1821_v26, %v1447_v27  ;;  %v1578_v46 = vor.u32 %v1853_v32, %v1575_v33  ;;  %v1703_v26 = vld [vmem:[%s2888_s1 + $0x418] sm:$0xf0]  ;;  %v1642_v27 = vor.u32 %v1869_v22, %v1639_v23  ;;  %v1695_v32 = vld [vmem:[%s2888_s1 + $0x408] sm:$0xf0]  ;;  %v1634_v33 = vor.u32 %v1867_v29, %v1631_v30 }
  0x6b   :  { %1122 = vmatpush.bf16.msrb.mxu3 %v1618_v39  ;;  %v1439_v39 = vld [vmem:[%s2888_s1 + $0x208] sm:$0xf0] }
  0x6c   :  { %1081 = vmatpush.bf16.msrb.mxu0 %v1418_v43  ;;  %v1881_v43 = vld [vmem:[%s2888_s1 + $0x3f4] sm:$0xf] }
  0x6d   :  { %1095 = vmatpush.bf16.msrb.mxu1 %v1482_v47  ;;  %v1503_v47 = vld [vmem:[%s2888_s1 + $0x288] sm:$0xf0]  ;;  %v1690_v54 = vor.u32 %v1881_v43, %v1687_v45 }
  0x6e   :  { %1109 = vmatpush.bf16.msrb.mxu2 %v1546_v51  ;;  %v1378_v51 = vor.u32 %v1803_v34, %v1375_v37  ;;  %v1506_v2 = vor.u32 %v1835_v42, %v1503_v47  ;;  %v185_v37 = vld [vmem:[%s2890_s2] sm:$0x3] }
  0x6f   :  { %1123 = vmatpush.bf16.msrb.mxu3 %v1610_v53  ;;  %v1442_v53 = vor.u32 %v1819_v38, %v1439_v39  ;;  %v187_v38 = vperm.slane %v185_v37, 0 }
  0x70   :  { %1082 = vmatpush.bf16.msrb.mxu0 %v1410_v55  ;;  %v1754_v55 = vor.u32 %v1897_v49, %v1751_v50 }
  0x71   :  { %1096 = vmatpush.bf16.msrb.mxu1 %v1474_v57  ;;  %v1570_v57 = vor.u32 %v1851_v52, %v1567_v8 }
  0x72   :  { %1110 = vmatpush.bf16.msrb.mxu2 %v1538_v61  ;;  %v1682_v61 = vor.u32 %v1879_v56, %v1679_v60 }
  0x73   :  { %1124 = vmatpush.bf16.msrb.mxu3 %v1602_v0  ;;  %v1671_v0 = vld [vmem:[%s2888_s1 + $0x3d8] sm:$0xf0] }
  0x74   :  { %1083 = vmatpush.bf16.msrb.mxu0 %v1402_v4  ;;  %v1674_v4 = vor.u32 %v1877_v63, %v1671_v0 }
  0x75   :  { %1097 = vmatpush.bf16.msrb.mxu1 %v1466_v7 }
  0x76   :  { %1111 = vmatpush.bf16.msrb.mxu2 %v1530_v11  ;;  %v1889_v11 = vld [vmem:[%s2888_s1 + $0x434] sm:$0xf] }
  0x77   :  { %1125 = vmatpush.bf16.msrb.mxu3 %v1594_v15  ;;  %v1722_v15 = vor.u32 %v1889_v11, %v1719_v12 }
  0x78   :  { %1084 = vmatpush.bf16.msrb.mxu0 %v1394_v18  ;;  %v1887_v18 = vld [vmem:[%s2888_s1 + $0x424] sm:$0xf] }
  0x79   :  { %1098 = vmatpush.bf16.msrb.mxu1 %v1458_v21  ;;  %v1714_v21 = vor.u32 %v1887_v18, %v1711_v19 }
  0x7a   :  { %1112 = vmatpush.bf16.msrb.mxu2 %v1522_v24  ;;  %v1885_v24 = vld [vmem:[%s2888_s1 + $0x414] sm:$0xf] }
  0x7b   :  { %1126 = vmatpush.bf16.msrb.mxu3 %v1586_v28  ;;  %v1706_v28 = vor.u32 %v1885_v24, %v1703_v26 }
  0x7c   :  { %1085 = vmatpush.bf16.msrb.mxu0 %v1386_v31  ;;  %v1883_v31 = vld [vmem:[%s2888_s1 + $0x404] sm:$0xf] }
  0x7d   :  { %1099 = vmatpush.bf16.msrb.mxu1 %v1450_v35  ;;  %v1698_v34 = vor.u32 %v1883_v31, %v1695_v32 }
  0x7e   :  { %1113 = vmatpush.bf16.msrb.mxu2 %v1514_v41 }
  0x7f   :  { %1127 = vmatpush.bf16.msrb.mxu3 %v1578_v46 }
  0x80   :  { %1086 = vmatpush.bf16.msrb.mxu0 %v1378_v51 }
  0x81   :  { %1100 = vmatpush.bf16.msrb.mxu1 %v1442_v53 }
  0x82   :  { %1114 = vmatpush.bf16.msrb.mxu2 %v1506_v2 }
  0x83   :  { %1128 = vmatpush.bf16.msrb.mxu3 %v1570_v57  ;;  %1087 = vmatmul.bf16.vlgmr.msrb.gmra.mxu0 %v2218_v14  ;;  %v1875_v14 = vld [vmem:[%s2888_s1 + $0x3c4] sm:$0xf] }
  0x84   :  { %1135 = vmatpush.bf16.msra.mxu0 %v1690_v54  ;;  %1101 = vmatmul.bf16.vlgmr.msrb.gmra.mxu1 %v2390_v36  ;;  %v1891_v36 = vld [vmem:[%s2888_s1 + $0x444] sm:$0xf] }
  0x85   :  { %1149 = vmatpush.bf16.msra.mxu1 %v1754_v55  ;;  %1115 = vmatmul.bf16.vlgmr.msrb.gmra.mxu2 %v2409_v44  ;;  %v1727_v44 = vld [vmem:[%s2888_s1 + $0x448] sm:$0xf0] }
  0x86   :  { %1129 = vmatmul.bf16.vlgmr.msrb.gmra.mxu3 %v2401_v40  ;;  %v1666_v40 = vor.u32 %v1875_v14, %v1663_v6  ;;  %v1730_v7 = vor.u32 %v1891_v36, %v1727_v44 }
  0x88   :  { %1136 = vmatpush.bf16.msra.mxu0 %v1682_v61 }
  0x89   :  { %1150 = vmatpush.bf16.msra.mxu1 %v1746_v62 }
  0x8c   :  { %1137 = vmatpush.bf16.msra.mxu0 %v1674_v4 }
  0x8d   :  { %1151 = vmatpush.bf16.msra.mxu1 %v1738_v5 }
  0x90   :  { %1138 = vmatpush.bf16.msra.mxu0 %v1666_v40 }
  0x91   :  { %1152 = vmatpush.bf16.msra.mxu1 %v1730_v7 }
  0x94   :  { %1139 = vmatpush.bf16.msra.mxu0 %v1658_v13  ;;  %v188_v13 = vperm.slane %v185_v37, 1 }
  0x95   :  { %1153 = vmatpush.bf16.msra.mxu1 %v1722_v15 }
  0x98   :  { %1140 = vmatpush.bf16.msra.mxu0 %v1650_v20 }
  0x99   :  { %1154 = vmatpush.bf16.msra.mxu1 %v1714_v21 }
  0x9c   :  { %1141 = vmatpush.bf16.msra.mxu0 %v1642_v27 }
  0x9d   :  { %1155 = vmatpush.bf16.msra.mxu1 %v1706_v28 }
  0xa0   :  { %1142 = vmatpush.bf16.msra.mxu0 %v1634_v33  ;;  %v920_v35 = vpop.f32.mrf.mxu0 }
  0xa1   :  { %1156 = vmatpush.bf16.msra.mxu1 %v1698_v34  ;;  %v934_v39 = vpop.f32.mrf.mxu1  ;;  %v921_v42 = vadd.f32 %v920_v35, %v187_v38 }
  0xa3   :  { %1143 = vmatmul.bf16.vlgmr.msra.gmra.mxu0 %v2417_v48  ;;  %v935_v46 = vadd.f32 %v934_v39, %v921_v42 }
  0xa4   :  { %1157 = vmatmul.bf16.vlgmr.msra.gmra.mxu1 %v2609_v25 }
  0xa8   :  { %v948_v41 = vpop.f32.mrf.mxu2  ;;  %v922_v43 = vpop.f32.mrf.mxu0 }
  0xa9   :  { %v962_v45 = vpop.f32.mrf.mxu3  ;;  %v936_v47 = vpop.f32.mrf.mxu1  ;;  %v949_v49 = vadd.f32 %v948_v41, %v935_v46  ;;  %v923_v52 = vadd.f32 %v922_v43, %v187_v38 }
  0xab   :  { %v963_v48 = vadd.f32 %v962_v45, %v949_v49  ;;  %v937_v25 = vadd.f32 %v936_v47, %v923_v52 }
  0xb0   :  { %v950_v50 = vpop.f32.mrf.mxu2 }
  0xb1   :  { %v964_v8 = vpop.f32.mrf.mxu3  ;;  %v951_v55 = vadd.f32 %v950_v50, %v937_v25 }
  0xb3   :  { %v965_v58 = vadd.f32 %v964_v8, %v951_v55 }
  0xc0   :  { %v976_v51 = vpop.f32.mrf.mxu0 }
  0xc1   :  { %v977_v53 = vadd.f32 %v976_v51, %v963_v48  ;;  %v990_v54 = vpop.f32.mrf.mxu1 }
  0xc3   :  { %v991_v56 = vadd.f32 %v990_v54, %v977_v53 }
  0xc8   :  { %v1004_v2 = vpop.f32.mrf.mxu2  ;;  %v978_v60 = vpop.f32.mrf.mxu0 }
  0xc9   :  { %v1018_v57 = vpop.f32.mrf.mxu3  ;;  %v1005_v59 = vadd.f32 %v1004_v2, %v991_v56  ;;  %v979_v61 = vadd.f32 %v978_v60, %v965_v58  ;;  %v992_v62 = vpop.f32.mrf.mxu1 }
  0xcb   :  { %v1019_v63 = vadd.f32 %v1018_v57, %v1005_v59  ;;  %v993_v3 = vadd.f32 %v992_v62, %v979_v61 }
  0xd0   :  { %v1006_v0 = vpop.f32.mrf.mxu2 }
  0xd1   :  { %v1007_v5 = vadd.f32 %v1006_v0, %v993_v3  ;;  %v1020_v6 = vpop.f32.mrf.mxu3 }
  0xd3   :  { %v1021_v44 = vadd.f32 %v1020_v6, %v1007_v5 }
  0xe0   :  { %v1032_v1 = vpop.f32.mrf.mxu0 }
  0xe1   :  { %v1033_v4 = vadd.f32 %v1032_v1, %v1019_v63  ;;  %v1046_v11 = vpop.f32.mrf.mxu1 }
  0xe2   :  { %v1047_v17 = vadd.f32 %v1046_v11, %v188_v13 }
  0xe3   :  { %v1163_v14 = vmul.f32 0.2, %v1033_v4 }
  0xe5   :  { %v1167_v36 = vmax.f32 %v1033_v4, %v1163_v14 }
  0xe7   :  { %1171 = vst [vmem:[%s2891_s3] sm:$0xff] %v1167_v36 }
  0xe8   :  { %v1034_v40 = vpop.f32.mrf.mxu0  ;;  %v1060_v12 = vpop.f32.mrf.mxu2 }
  0xe9   :  { %v1035_v7 = vadd.f32 %v1034_v40, %v1021_v44  ;;  %v1048_v15 = vpop.f32.mrf.mxu1  ;;  %v1074_v16 = vpop.f32.mrf.mxu3  ;;  %v1061_v18 = vadd.f32 %v1060_v12, %v1047_v17 }
  0xea   :  { %v1049_v24 = vadd.f32 %v1048_v15, %v188_v13 }
  0xeb   :  { %v1165_v9 = vmul.f32 0.2, %v1035_v7  ;;  %v1075_v21 = vadd.f32 %v1074_v16, %v1061_v18 }
  0xed   :  { %v1169_v10 = vmax.f32 %v1035_v7, %v1165_v9 }
  0xef   :  { %1173 = vst [vmem:[%s2891_s3 + $0x10] sm:$0xff] %v1169_v10 }
  0xf0   :  { %v1062_v19 = vpop.f32.mrf.mxu2 }
  0xf1   :  { %v1076_v23 = vpop.f32.mrf.mxu3  ;;  %v1063_v28 = vadd.f32 %v1062_v19, %v1049_v24 }
  0xf3   :  { %v1077_v33 = vadd.f32 %v1076_v23, %v1063_v28 }
 0x100   :  { %v1088_v20 = vpop.f32.mrf.mxu0 }
 0x101   :  { %v1102_v22 = vpop.f32.mrf.mxu1  ;;  %v1089_v26 = vadd.f32 %v1088_v20, %v1075_v21 }
 0x103   :  { %v1103_v29 = vadd.f32 %v1102_v22, %v1089_v26 }
 0x108   :  { %v1116_v27 = vpop.f32.mrf.mxu2  ;;  %v1090_v30 = vpop.f32.mrf.mxu0 }
 0x109   :  { %v1104_v31 = vpop.f32.mrf.mxu1  ;;  %v1130_v32 = vpop.f32.mrf.mxu3  ;;  %v1117_v34 = vadd.f32 %v1116_v27, %v1103_v29  ;;  %v1091_v35 = vadd.f32 %v1090_v30, %v1077_v33 }
 0x10b   :  { %v1131_v37 = vadd.f32 %v1130_v32, %v1117_v34  ;;  %v1105_v41 = vadd.f32 %v1104_v31, %v1091_v35 }
 0x110   :  { %v1118_v38 = vpop.f32.mrf.mxu2 }
 0x111   :  { %v1119_v45 = vadd.f32 %v1118_v38, %v1105_v41  ;;  %v1132_v47 = vpop.f32.mrf.mxu3 }
 0x113   :  { %v1133_v50 = vadd.f32 %v1132_v47, %v1119_v45 }
 0x120   :  { %v1144_v39 = vpop.f32.mrf.mxu0 }
 0x121   :  { %v1145_v42 = vadd.f32 %v1144_v39, %v1131_v37  ;;  %v1158_v43 = vpop.f32.mrf.mxu1 }
 0x123   :  { %v1159_v46 = vadd.f32 %v1158_v43, %v1145_v42 }
 0x125   :  { %v1164_v49 = vmul.f32 0.2, %v1159_v46 }
 0x127   :  { %v1168_v51 = vmax.f32 %v1159_v46, %v1164_v49 }
 0x128   :  { %v1146_v52 = vpop.f32.mrf.mxu0 }
 0x129   :  { %1172 = vst [vmem:[%s2891_s3 + $0x8] sm:$0xff] %v1168_v51  ;;  %v1147_v48 = vadd.f32 %v1146_v52, %v1133_v50  ;;  %v1160_v8 = vpop.f32.mrf.mxu1 }
 0x12b   :  { %v1161_v25 = vadd.f32 %v1160_v8, %v1147_v48 }
 0x12d   :  { %v1166_v53 = vmul.f32 0.2, %v1161_v25 }
 0x12f   :  { %v1170_v54 = vmax.f32 %v1161_v25, %v1166_v53 }
 0x131   :  { %1174 = vst [vmem:[%s2891_s3 + $0x18] sm:$0xff] %v1170_v54 }

</bundles_post_ra>
